<compile_context>
chip_gen: v5e
topology: v5e:2x2
jax: 0.10.0
libtpu: 0.0.40
codegen_flags: <defaults>
</compile_context>

<pallas_src>
import functools

import jax
import jax.numpy as jnp
from jax.experimental import pallas as pl
from jax.experimental.pallas import tpu as pltpu


EMB = 96          # 3 * (embedding_dimension // 3); the reference 128 is
                  # internally inconsistent (3 * int(128/3) != 128).
EMB_PAD = 128     # lane-dense padded embedding width
NEG_SLOPE = 0.01  # PyTorch nn.LeakyReLU default


def _round_up(x, m):
    return (x + m - 1) // m * m


def _leaky_relu(x):
    return jnp.where(x > 0, x, NEG_SLOPE * x)


def _dot(a, b):
    return jnp.dot(a, b, preferred_element_type=jnp.float32)


# --------------------------------------------------------------------------
# Kernel 1: fused front-end MLPs  ->  M1 = dinv * (H @ W1)
#   H = LeakyReLU( LeakyReLU(X_pad @ Wf + bf) @ Win + bin )
# (Wf is the block-diagonal fusion of the des / num_prop / cat_prop linears.)
# --------------------------------------------------------------------------
def frontend_kernel(x_ref, dinv_ref, wf_ref, bf_ref, win_ref, bin_ref,
                    w1_ref, m1_ref):
    h0 = _leaky_relu(_dot(x_ref[...], wf_ref[...]) + bf_ref[...])
    h = _leaky_relu(_dot(h0.astype(jnp.bfloat16), win_ref[...]) + bin_ref[...])
    m1 = dinv_ref[...] * _dot(h.astype(jnp.bfloat16), w1_ref[...])
    m1_ref[...] = m1.astype(m1_ref.dtype)


# --------------------------------------------------------------------------
# Kernel 2: GCN layer 1 aggregation + layer-2 projection folded in epilogue.
#   H2 = dinv * (A @ M1) + b1        (== Â @ (H W1) + b1; dropout = identity)
#   M2 = dinv * (H2 @ W2)
# --------------------------------------------------------------------------
def gcn1_kernel(a_ref, m_ref, dinv_ref, b1_ref, w2_ref, m2_ref, acc_ref, *,
                tk):
    k = pl.program_id(1)

    @pl.when(k == 0)
    def _():
        acc_ref[...] = jnp.zeros_like(acc_ref)

    off = pl.multiple_of(k * tk, tk)
    acc_ref[...] += _dot(a_ref[...], m_ref[pl.ds(off, tk), :])

    @pl.when(k == pl.num_programs(1) - 1)
    def _():
        h2 = dinv_ref[...] * acc_ref[...] + b1_ref[...]
        m2 = dinv_ref[...] * _dot(h2.astype(jnp.bfloat16), w2_ref[...])
        m2_ref[...] = m2.astype(m2_ref.dtype)


# --------------------------------------------------------------------------
# Kernel 3: GCN layer 2 aggregation + output MLP in epilogue.
#   H3  = dinv * (A @ M2) + b2       (== Â @ (H2 W2) + b2)
#   out = LeakyReLU(H3 @ Wo1 + bo1) @ Wo2_pad + bo2_pad   (lane-dense, 128)
# --------------------------------------------------------------------------
def gcn2_kernel(a_ref, m_ref, dinv_ref, b2_ref, wo1_ref, bo1_ref, wo2_ref,
                bo2_ref, out_ref, acc_ref, *, tk):
    k = pl.program_id(1)

    @pl.when(k == 0)
    def _():
        acc_ref[...] = jnp.zeros_like(acc_ref)

    off = pl.multiple_of(k * tk, tk)
    acc_ref[...] += _dot(a_ref[...], m_ref[pl.ds(off, tk), :])

    @pl.when(k == pl.num_programs(1) - 1)
    def _():
        h3 = dinv_ref[...] * acc_ref[...] + b2_ref[...]
        o1 = _leaky_relu(_dot(h3.astype(jnp.bfloat16), wo1_ref[...])
                         + bo1_ref[...])
        out_ref[...] = (_dot(o1.astype(jnp.bfloat16), wo2_ref[...])
                        + bo2_ref[...]).astype(out_ref.dtype)


# --------------------------------------------------------------------------
# Glue: dense (A + remaining self loops) in bf16, plus dinv = deg^{-1/2}.
# The symmetric normalisation itself is applied inside the kernels.
# --------------------------------------------------------------------------
def build_adjacency(edge_index, num_nodes, num_nodes_padded):
    src = edge_index[0]
    dst = edge_index[1]
    a = jnp.zeros((num_nodes, num_nodes), jnp.float32)
    a = a.at[dst, src].add(1.0)
    # add_remaining_self_loops: only add a self loop where none exists.
    diag = jnp.diagonal(a)
    a = a + jnp.diag(jnp.where(diag > 0.0, 0.0, 1.0))
    deg = a.sum(axis=1)
    dinv = jnp.where(deg > 0.0, jax.lax.rsqrt(deg), 0.0)

    a_pad = jnp.zeros((num_nodes_padded, num_nodes_padded), jnp.bfloat16)
    a_pad = a_pad.at[:num_nodes, :num_nodes].set(a.astype(jnp.bfloat16))
    dinv_pad = jnp.zeros((num_nodes_padded, 1), jnp.float32)
    dinv_pad = dinv_pad.at[:num_nodes, 0].set(dinv)
    return a_pad, dinv_pad


def init_params(key, des_size, num_prop_size, cat_prop_size, emb=EMB):
    h3 = emb // 3
    assert 3 * h3 == emb, "embedding dimension must be divisible by 3"

    def lin(k, fan_in, fan_out):
        k1, k2 = jax.random.split(k)
        bound = 1.0 / float(fan_in) ** 0.5
        w = jax.random.uniform(k1, (fan_in, fan_out), jnp.float32, -bound, bound)
        b = jax.random.uniform(k2, (1, fan_out), jnp.float32, -bound, bound)
        return w, b

    keys = jax.random.split(key, 8)
    wd, bd = lin(keys[0], des_size, h3)
    wn, bn = lin(keys[1], num_prop_size, h3)
    wc, bc = lin(keys[2], cat_prop_size, h3)
    win, bin_ = lin(keys[3], emb, emb)
    w1, b1 = lin(keys[4], emb, emb)      # GCNConv 1 weight/bias
    w2, b2 = lin(keys[5], emb, emb)      # GCNConv 2 weight/bias
    wo1, bo1 = lin(keys[6], emb, emb)
    wo2, bo2 = lin(keys[7], emb, 2)

    f = des_size + num_prop_size + cat_prop_size
    f_pad = _round_up(f, 128)

    # Block-diagonal fused front-end weight (concat order: des | num | cat).
    wf = jnp.zeros((f_pad, EMB_PAD), jnp.float32)
    wf = wf.at[:des_size, :h3].set(wd)
    wf = wf.at[des_size:des_size + num_prop_size, h3:2 * h3].set(wn)
    wf = wf.at[des_size + num_prop_size:f, 2 * h3:3 * h3].set(wc)
    bf_ = jnp.zeros((1, EMB_PAD), jnp.float32)
    bf_ = bf_.at[:, :emb].set(jnp.concatenate([bd, bn, bc], axis=1))

    def pad_sq(w):
        return jnp.zeros((EMB_PAD, EMB_PAD), jnp.float32).at[:emb, :emb].set(w)

    def pad_b(b):
        return jnp.zeros((1, EMB_PAD), jnp.float32).at[:, :b.shape[1]].set(b)

    wo2_p = jnp.zeros((EMB_PAD, EMB_PAD), jnp.float32).at[:emb, :2].set(wo2)

    bf16 = jnp.bfloat16
    return dict(
        wf=wf.astype(bf16), bf=bf_,
        win=pad_sq(win).astype(bf16), bin=pad_b(bin_),
        w1=pad_sq(w1).astype(bf16), b1=pad_b(b1),
        w2=pad_sq(w2).astype(bf16), b2=pad_b(b2),
        wo1=pad_sq(wo1).astype(bf16), bo1=pad_b(bo1),
        wo2=wo2_p.astype(bf16), bo2=pad_b(bo2),
    )


def _vmem_limit_bytes(n_pad, f_pad, tm, tk):
    resident = 2 * n_pad * EMB_PAD * 2                       # resident M (x2)
    streamed = 2 * (tm * tk * 2 + tm * f_pad * 2 + tm * EMB_PAD * 4)
    weights = 2 * (f_pad + 6 * EMB_PAD) * EMB_PAD * 2 + 10 * EMB_PAD * 4
    acc = tm * EMB_PAD * 4
    total = int(1.5 * (resident + streamed + weights + acc)) + (2 << 20)
    # floor above default scoped limits, cap below v7x physical (64 MiB).
    return max(32 << 20, min(total, 64 << 20))


@functools.partial(jax.jit, static_argnames=("num_nodes",))
def botgcn_single(des, tweet, num_prop, cat_prop, edge_index, params,
                  num_nodes):
    del tweet  # unused by the reference forward()
    n = num_nodes
    n_pad = _round_up(n, 128)
    tm = 256 if n_pad % 256 == 0 else 128
    if n_pad % 512 == 0:
        tk = 512
    elif n_pad % 256 == 0:
        tk = 256
    else:
        tk = 128

    a_pad, dinv = build_adjacency(edge_index, n, n_pad)

    x = jnp.concatenate([des, num_prop, cat_prop], axis=1).astype(jnp.bfloat16)
    f = x.shape[1]
    f_pad = params["wf"].shape[0]
    x_pad = jnp.zeros((n_pad, f_pad), jnp.bfloat16).at[:n, :f].set(x)

    vmem_limit = _vmem_limit_bytes(n_pad, f_pad, tm, tk)

    # ---- front-end MLPs -> M1 = dinv * (H @ W1) ----
    m1 = pl.pallas_call(
        frontend_kernel,
        out_shape=jax.ShapeDtypeStruct((n_pad, EMB_PAD), jnp.bfloat16),
        grid=(n_pad // tm,),
        in_specs=[
            pl.BlockSpec((tm, f_pad), lambda i: (i, 0)),
            pl.BlockSpec((tm, 1), lambda i: (i, 0)),
            pl.BlockSpec((f_pad, EMB_PAD), lambda i: (0, 0)),
            pl.BlockSpec((1, EMB_PAD), lambda i: (0, 0)),
            pl.BlockSpec((EMB_PAD, EMB_PAD), lambda i: (0, 0)),
            pl.BlockSpec((1, EMB_PAD), lambda i: (0, 0)),
            pl.BlockSpec((EMB_PAD, EMB_PAD), lambda i: (0, 0)),
        ],
        out_specs=pl.BlockSpec((tm, EMB_PAD), lambda i: (i, 0)),
        compiler_params=pltpu.CompilerParams(
            dimension_semantics=("parallel",),
            vmem_limit_bytes=vmem_limit),
    )(x_pad, dinv, params["wf"], params["bf"], params["win"], params["bin"],
      params["w1"])

    gcn_grid = (n_pad // tm, n_pad // tk)
    gcn_cp = pltpu.CompilerParams(
        dimension_semantics=("parallel", "arbitrary"),
        vmem_limit_bytes=vmem_limit)

    # ---- GCN layer 1 (+ layer-2 projection in epilogue) -> M2 ----
    m2 = pl.pallas_call(
        functools.partial(gcn1_kernel, tk=tk),
        out_shape=jax.ShapeDtypeStruct((n_pad, EMB_PAD), jnp.bfloat16),
        grid=gcn_grid,
        in_specs=[
            pl.BlockSpec((tm, tk), lambda i, k: (i, k)),            # A block
            pl.BlockSpec((n_pad, EMB_PAD), lambda i, k: (0, 0)),    # M1 resident
            pl.BlockSpec((tm, 1), lambda i, k: (i, 0)),             # dinv rows
            pl.BlockSpec((1, EMB_PAD), lambda i, k: (0, 0)),        # b1
            pl.BlockSpec((EMB_PAD, EMB_PAD), lambda i, k: (0, 0)),  # W2
        ],
        out_specs=pl.BlockSpec((tm, EMB_PAD), lambda i, k: (i, 0)),
        scratch_shapes=[pltpu.VMEM((tm, EMB_PAD), jnp.float32)],
        compiler_params=gcn_cp,
    )(a_pad, m1, dinv, params["b1"], params["w2"])

    # ---- GCN layer 2 (+ output MLP in epilogue) -> lane-dense logits ----
    logits_pad = pl.pallas_call(
        functools.partial(gcn2_kernel, tk=tk),
        out_shape=jax.ShapeDtypeStruct((n_pad, EMB_PAD), jnp.float32),
        grid=gcn_grid,
        in_specs=[
            pl.BlockSpec((tm, tk), lambda i, k: (i, k)),            # A block
            pl.BlockSpec((n_pad, EMB_PAD), lambda i, k: (0, 0)),    # M2 resident
            pl.BlockSpec((tm, 1), lambda i, k: (i, 0)),             # dinv rows
            pl.BlockSpec((1, EMB_PAD), lambda i, k: (0, 0)),        # b2
            pl.BlockSpec((EMB_PAD, EMB_PAD), lambda i, k: (0, 0)),  # Wo1
            pl.BlockSpec((1, EMB_PAD), lambda i, k: (0, 0)),        # bo1
            pl.BlockSpec((EMB_PAD, EMB_PAD), lambda i, k: (0, 0)),  # Wo2 (pad)
            pl.BlockSpec((1, EMB_PAD), lambda i, k: (0, 0)),        # bo2 (pad)
        ],
        out_specs=pl.BlockSpec((tm, EMB_PAD), lambda i, k: (i, 0)),
        scratch_shapes=[pltpu.VMEM((tm, EMB_PAD), jnp.float32)],
        compiler_params=gcn_cp,
    )(a_pad, m2, dinv, params["b2"], params["wo1"], params["bo1"],
      params["wo2"], params["bo2"])

    return logits_pad[:n, :2]


if __name__ == "__main__":
    # Small, self-consistent shapes (N not a multiple of 128 to exercise
    # padding; grid has multiple row and reduction blocks).
    N = 300
    DES_SIZE = 32
    TWEET_SIZE = 32
    NUM_PROP_SIZE = 4
    CAT_PROP_SIZE = 3
    E = 900

    key = jax.random.PRNGKey(0)
    k_des, k_tw, k_num, k_cat, k_edge, k_param = jax.random.split(key, 6)

    des = jax.random.normal(k_des, (N, DES_SIZE), jnp.float32)
    tweet = jax.random.normal(k_tw, (N, TWEET_SIZE), jnp.float32)
    num_prop = jax.random.normal(k_num, (N, NUM_PROP_SIZE), jnp.float32)
    cat_prop = jax.random.normal(k_cat, (N, CAT_PROP_SIZE), jnp.float32)
    edge_index = jax.random.randint(k_edge, (2, E), 0, N, jnp.int32)

    params = init_params(k_param, DES_SIZE, NUM_PROP_SIZE, CAT_PROP_SIZE, EMB)

    out = botgcn_single(des, tweet, num_prop, cat_prop, edge_index, params,
                        num_nodes=N)
    out = jax.block_until_ready(out)
    assert out.shape == (N, 2) and out.dtype == jnp.float32
    assert bool(jnp.all(jnp.isfinite(out)))
    print("KERNEL_OK")
</pallas_src>

<mosaic_0001>
module attributes {stable_mosaic.version = 11 : i64} {
  func.func @frontend_kernel(%arg0: i32, %arg1: memref<128x128xbf16, #tpu.memory_space<vmem>>, %arg2: memref<128x1xf32, #tpu.memory_space<vmem>>, %arg3: memref<128x128xbf16, #tpu.memory_space<vmem>>, %arg4: memref<1x128xf32, #tpu.memory_space<vmem>>, %arg5: memref<128x128xbf16, #tpu.memory_space<vmem>>, %arg6: memref<1x128xf32, #tpu.memory_space<vmem>>, %arg7: memref<128x128xbf16, #tpu.memory_space<vmem>>, %arg8: memref<128x128xbf16, #tpu.memory_space<vmem>>) attributes {dimension_semantics = [#tpu.dimension_semantics<parallel>], iteration_bounds = array<i64: 3>, scalar_prefetch = 0 : i64, scratch_operands = 0 : i64, tpu.core_type = #tpu.core_type<tc>, window_params = [{transform_indices = @transform_0, window_bounds = array<i64: 128, 128>}, {transform_indices = @transform_1, window_bounds = array<i64: 128, 1>}, {pipeline_mode = #tpu.pipeline_mode<synchronous>, transform_indices = @transform_2, window_bounds = array<i64: 128, 128>}, {pipeline_mode = #tpu.pipeline_mode<synchronous>, transform_indices = @transform_3, window_bounds = array<i64: 1, 128>}, {pipeline_mode = #tpu.pipeline_mode<synchronous>, transform_indices = @transform_4, window_bounds = array<i64: 128, 128>}, {pipeline_mode = #tpu.pipeline_mode<synchronous>, transform_indices = @transform_5, window_bounds = array<i64: 1, 128>}, {pipeline_mode = #tpu.pipeline_mode<synchronous>, transform_indices = @transform_6, window_bounds = array<i64: 128, 128>}, {transform_indices = @transform_7, window_bounds = array<i64: 128, 128>}]} {
    %c0 = arith.constant 0 : index
    %c0_0 = arith.constant 0 : index
    %0 = vector.load %arg1[%c0, %c0_0] : memref<128x128xbf16, #tpu.memory_space<vmem>>, vector<128x128xbf16>
    %c0_1 = arith.constant 0 : index
    %c0_2 = arith.constant 0 : index
    %1 = vector.load %arg3[%c0_1, %c0_2] : memref<128x128xbf16, #tpu.memory_space<vmem>>, vector<128x128xbf16>
    %cst = arith.constant dense<0.000000e+00> : vector<128x128xf32>
    %2 = tpu.matmul %0, %1, %cst {dimension_numbers = #tpu.dot_dimension_numbers<[1], [0], [0], [1], [0, 0, 1, 1], [], []>} : vector<128x128xbf16>, vector<128x128xbf16>, vector<128x128xf32> -> vector<128x128xf32>
    %c0_3 = arith.constant 0 : index
    %c0_4 = arith.constant 0 : index
    %3 = vector.load %arg4[%c0_3, %c0_4] : memref<1x128xf32, #tpu.memory_space<vmem>>, vector<1x128xf32>
    %4 = vector.broadcast %3 : vector<1x128xf32> to vector<128x128xf32>
    %5 = arith.addf %2, %4 : vector<128x128xf32>
    %cst_5 = arith.constant 0.000000e+00 : f32
    %6 = vector.broadcast %cst_5 : f32 to vector<128x128xf32>
    %7 = arith.cmpf ogt, %5, %6 : vector<128x128xf32>
    %cst_6 = arith.constant 0.00999999977 : f32
    %8 = vector.broadcast %cst_6 : f32 to vector<128x128xf32>
    %9 = arith.mulf %8, %5 : vector<128x128xf32>
    %10 = arith.select %7, %5, %9 : vector<128x128xi1>, vector<128x128xf32>
    %11 = arith.truncf %10 : vector<128x128xf32> to vector<128x128xbf16>
    %c0_7 = arith.constant 0 : index
    %c0_8 = arith.constant 0 : index
    %12 = vector.load %arg5[%c0_7, %c0_8] : memref<128x128xbf16, #tpu.memory_space<vmem>>, vector<128x128xbf16>
    %cst_9 = arith.constant dense<0.000000e+00> : vector<128x128xf32>
    %13 = tpu.matmul %11, %12, %cst_9 {dimension_numbers = #tpu.dot_dimension_numbers<[1], [0], [0], [1], [0, 0, 1, 1], [], []>} : vector<128x128xbf16>, vector<128x128xbf16>, vector<128x128xf32> -> vector<128x128xf32>
    %c0_10 = arith.constant 0 : index
    %c0_11 = arith.constant 0 : index
    %14 = vector.load %arg6[%c0_10, %c0_11] : memref<1x128xf32, #tpu.memory_space<vmem>>, vector<1x128xf32>
    %15 = vector.broadcast %14 : vector<1x128xf32> to vector<128x128xf32>
    %16 = arith.addf %13, %15 : vector<128x128xf32>
    %cst_12 = arith.constant 0.000000e+00 : f32
    %17 = vector.broadcast %cst_12 : f32 to vector<128x128xf32>
    %18 = arith.cmpf ogt, %16, %17 : vector<128x128xf32>
    %cst_13 = arith.constant 0.00999999977 : f32
    %19 = vector.broadcast %cst_13 : f32 to vector<128x128xf32>
    %20 = arith.mulf %19, %16 : vector<128x128xf32>
    %21 = arith.select %18, %16, %20 : vector<128x128xi1>, vector<128x128xf32>
    %c0_14 = arith.constant 0 : index
    %c0_15 = arith.constant 0 : index
    %22 = vector.load %arg2[%c0_14, %c0_15] : memref<128x1xf32, #tpu.memory_space<vmem>>, vector<128x1xf32>
    %23 = arith.truncf %21 : vector<128x128xf32> to vector<128x128xbf16>
    %c0_16 = arith.constant 0 : index
    %c0_17 = arith.constant 0 : index
    %24 = vector.load %arg7[%c0_16, %c0_17] : memref<128x128xbf16, #tpu.memory_space<vmem>>, vector<128x128xbf16>
    %cst_18 = arith.constant dense<0.000000e+00> : vector<128x128xf32>
    %25 = tpu.matmul %23, %24, %cst_18 {dimension_numbers = #tpu.dot_dimension_numbers<[1], [0], [0], [1], [0, 0, 1, 1], [], []>} : vector<128x128xbf16>, vector<128x128xbf16>, vector<128x128xf32> -> vector<128x128xf32>
    %26 = vector.broadcast %22 : vector<128x1xf32> to vector<128x128xf32>
    %27 = arith.mulf %26, %25 : vector<128x128xf32>
    %28 = arith.truncf %27 : vector<128x128xf32> to vector<128x128xbf16>
    %c0_19 = arith.constant 0 : index
    %c0_20 = arith.constant 0 : index
    %29 = vector.load %arg8[%c0_19, %c0_20] : memref<128x128xbf16, #tpu.memory_space<vmem>>, vector<128x128xbf16>
    tpu.vector_store %arg8[%c0_19, %c0_20], %28 {strides = array<i32>} : memref<128x128xbf16, #tpu.memory_space<vmem>>, vector<128x128xbf16>,
    return
  }
  func.func @transform_0(%arg0: i32) -> (i32, i32) {
    %c0_i32 = arith.constant 0 : i32
    %c0_i32_0 = arith.constant 0 : i32
    return %arg0, %c0_i32 : i32, i32
  }
  func.func @transform_1(%arg0: i32) -> (i32, i32) {
    %c0_i32 = arith.constant 0 : i32
    %c0_i32_0 = arith.constant 0 : i32
    return %arg0, %c0_i32 : i32, i32
  }
  func.func @transform_2(%arg0: i32) -> (i32, i32) {
    %c0_i32 = arith.constant 0 : i32
    %c0_i32_0 = arith.constant 0 : i32
    %c0_i32_1 = arith.constant 0 : i32
    return %c0_i32, %c0_i32_0 : i32, i32
  }
  func.func @transform_3(%arg0: i32) -> (i32, i32) {
    %c0_i32 = arith.constant 0 : i32
    %c0_i32_0 = arith.constant 0 : i32
    %c0_i32_1 = arith.constant 0 : i32
    return %c0_i32, %c0_i32_0 : i32, i32
  }
  func.func @transform_4(%arg0: i32) -> (i32, i32) {
    %c0_i32 = arith.constant 0 : i32
    %c0_i32_0 = arith.constant 0 : i32
    %c0_i32_1 = arith.constant 0 : i32
    return %c0_i32, %c0_i32_0 : i32, i32
  }
  func.func @transform_5(%arg0: i32) -> (i32, i32) {
    %c0_i32 = arith.constant 0 : i32
    %c0_i32_0 = arith.constant 0 : i32
    %c0_i32_1 = arith.constant 0 : i32
    return %c0_i32, %c0_i32_0 : i32, i32
  }
  func.func @transform_6(%arg0: i32) -> (i32, i32) {
    %c0_i32 = arith.constant 0 : i32
    %c0_i32_0 = arith.constant 0 : i32
    %c0_i32_1 = arith.constant 0 : i32
    return %c0_i32, %c0_i32_0 : i32, i32
  }
  func.func @transform_7(%arg0: i32) -> (i32, i32) {
    %c0_i32 = arith.constant 0 : i32
    %c0_i32_0 = arith.constant 0 : i32
    return %arg0, %c0_i32 : i32, i32
  }
}

module attributes {stable_mosaic.version = 11 : i64} {
  func.func @gcn1_kernel(%arg0: i32, %arg1: i32, %arg2: memref<128x128xbf16, #tpu.memory_space<vmem>>, %arg3: memref<384x128xbf16, #tpu.memory_space<vmem>>, %arg4: memref<128x1xf32, #tpu.memory_space<vmem>>, %arg5: memref<1x128xf32, #tpu.memory_space<vmem>>, %arg6: memref<128x128xbf16, #tpu.memory_space<vmem>>, %arg7: memref<128x128xbf16, #tpu.memory_space<vmem>>, %arg8: memref<128x128xf32, #tpu.memory_space<vmem>>) attributes {dimension_semantics = [#tpu.dimension_semantics<parallel>, #tpu.dimension_semantics<arbitrary>], iteration_bounds = array<i64: 3, 3>, scalar_prefetch = 0 : i64, scratch_operands = 1 : i64, tpu.core_type = #tpu.core_type<tc>, window_params = [{transform_indices = @transform_0, window_bounds = array<i64: 128, 128>}, {pipeline_mode = #tpu.pipeline_mode<synchronous>, transform_indices = @transform_1, window_bounds = array<i64: 384, 128>}, {transform_indices = @transform_2, window_bounds = array<i64: 128, 1>}, {pipeline_mode = #tpu.pipeline_mode<synchronous>, transform_indices = @transform_3, window_bounds = array<i64: 1, 128>}, {pipeline_mode = #tpu.pipeline_mode<synchronous>, transform_indices = @transform_4, window_bounds = array<i64: 128, 128>}, {transform_indices = @transform_5, window_bounds = array<i64: 128, 128>}]} {
    %c0_i32 = arith.constant 0 : i32
    %0 = arith.cmpi eq, %arg1, %c0_i32 : i32
    %1 = arith.extui %0 : i1 to i32
    %c0_i32_0 = arith.constant 0 : i32
    %2 = arith.cmpi ne, %1, %c0_i32_0 : i32
    scf.if %2 {
      %cst_8 = arith.constant 0.000000e+00 : f32
      %15 = vector.broadcast %cst_8 : f32 to vector<128x128xf32>
      %c0_9 = arith.constant 0 : index
      %c0_10 = arith.constant 0 : index
      %16 = vector.load %arg8[%c0_9, %c0_10] : memref<128x128xf32, #tpu.memory_space<vmem>>, vector<128x128xf32>
      tpu.vector_store %arg8[%c0_9, %c0_10], %15 {strides = array<i32>} : memref<128x128xf32, #tpu.memory_space<vmem>>, vector<128x128xf32>,
    } else {
    }
    %c128_i32 = arith.constant 128 : i32
    %3 = arith.muli %arg1, %c128_i32 : i32
    %4 = tpu.assume_multiple %3, 128 : i32
    %c0 = arith.constant 0 : index
    %c0_1 = arith.constant 0 : index
    %5 = vector.load %arg8[%c0, %c0_1] : memref<128x128xf32, #tpu.memory_space<vmem>>, vector<128x128xf32>
    %c0_2 = arith.constant 0 : index
    %c0_3 = arith.constant 0 : index
    %6 = vector.load %arg2[%c0_2, %c0_3] : memref<128x128xbf16, #tpu.memory_space<vmem>>, vector<128x128xbf16>
    %7 = arith.index_cast %4 : i32 to index
    %c0_4 = arith.constant 0 : index
    %8 = vector.load %arg3[%7, %c0_4] : memref<384x128xbf16, #tpu.memory_space<vmem>>, vector<128x128xbf16>
    %cst = arith.constant dense<0.000000e+00> : vector<128x128xf32>
    %9 = tpu.matmul %6, %8, %cst {dimension_numbers = #tpu.dot_dimension_numbers<[1], [0], [0], [1], [0, 0, 1, 1], [], []>} : vector<128x128xbf16>, vector<128x128xbf16>, vector<128x128xf32> -> vector<128x128xf32>
    %10 = arith.addf %5, %9 : vector<128x128xf32>
    %c0_5 = arith.constant 0 : index
    %c0_6 = arith.constant 0 : index
    %11 = vector.load %arg8[%c0_5, %c0_6] : memref<128x128xf32, #tpu.memory_space<vmem>>, vector<128x128xf32>
    tpu.vector_store %arg8[%c0_5, %c0_6], %10 {strides = array<i32>} : memref<128x128xf32, #tpu.memory_space<vmem>>, vector<128x128xf32>,
    %c2_i32 = arith.constant 2 : i32
    %12 = arith.cmpi eq, %arg1, %c2_i32 : i32
    %13 = arith.extui %12 : i1 to i32
    %c0_i32_7 = arith.constant 0 : i32
    %14 = arith.cmpi ne, %13, %c0_i32_7 : i32
    scf.if %14 {
      %c0_8 = arith.constant 0 : index
      %c0_9 = arith.constant 0 : index
      %15 = vector.load %arg4[%c0_8, %c0_9] : memref<128x1xf32, #tpu.memory_space<vmem>>, vector<128x1xf32>
      %c0_10 = arith.constant 0 : index
      %c0_11 = arith.constant 0 : index
      %16 = vector.load %arg8[%c0_10, %c0_11] : memref<128x128xf32, #tpu.memory_space<vmem>>, vector<128x128xf32>
      %17 = vector.broadcast %15 : vector<128x1xf32> to vector<128x128xf32>
      %18 = arith.mulf %17, %16 : vector<128x128xf32>
      %c0_12 = arith.constant 0 : index
      %c0_13 = arith.constant 0 : index
      %19 = vector.load %arg5[%c0_12, %c0_13] : memref<1x128xf32, #tpu.memory_space<vmem>>, vector<1x128xf32>
      %20 = vector.broadcast %19 : vector<1x128xf32> to vector<128x128xf32>
      %21 = arith.addf %18, %20 : vector<128x128xf32>
      %c0_14 = arith.constant 0 : index
      %c0_15 = arith.constant 0 : index
      %22 = vector.load %arg4[%c0_14, %c0_15] : memref<128x1xf32, #tpu.memory_space<vmem>>, vector<128x1xf32>
      %23 = arith.truncf %21 : vector<128x128xf32> to vector<128x128xbf16>
      %c0_16 = arith.constant 0 : index
      %c0_17 = arith.constant 0 : index
      %24 = vector.load %arg6[%c0_16, %c0_17] : memref<128x128xbf16, #tpu.memory_space<vmem>>, vector<128x128xbf16>
      %cst_18 = arith.constant dense<0.000000e+00> : vector<128x128xf32>
      %25 = tpu.matmul %23, %24, %cst_18 {dimension_numbers = #tpu.dot_dimension_numbers<[1], [0], [0], [1], [0, 0, 1, 1], [], []>} : vector<128x128xbf16>, vector<128x128xbf16>, vector<128x128xf32> -> vector<128x128xf32>
      %26 = vector.broadcast %22 : vector<128x1xf32> to vector<128x128xf32>
      %27 = arith.mulf %26, %25 : vector<128x128xf32>
      %28 = arith.truncf %27 : vector<128x128xf32> to vector<128x128xbf16>
      %c0_19 = arith.constant 0 : index
      %c0_20 = arith.constant 0 : index
      %29 = vector.load %arg7[%c0_19, %c0_20] : memref<128x128xbf16, #tpu.memory_space<vmem>>, vector<128x128xbf16>
      tpu.vector_store %arg7[%c0_19, %c0_20], %28 {strides = array<i32>} : memref<128x128xbf16, #tpu.memory_space<vmem>>, vector<128x128xbf16>,
    } else {
    }
    return
  }
  func.func @transform_0(%arg0: i32, %arg1: i32) -> (i32, i32) {
    %c0_i32 = arith.constant 0 : i32
    return %arg0, %arg1 : i32, i32
  }
  func.func @transform_1(%arg0: i32, %arg1: i32) -> (i32, i32) {
    %c0_i32 = arith.constant 0 : i32
    %c0_i32_0 = arith.constant 0 : i32
    %c0_i32_1 = arith.constant 0 : i32
    return %c0_i32, %c0_i32_0 : i32, i32
  }
  func.func @transform_2(%arg0: i32, %arg1: i32) -> (i32, i32) {
    %c0_i32 = arith.constant 0 : i32
    %c0_i32_0 = arith.constant 0 : i32
    return %arg0, %c0_i32 : i32, i32
  }
  func.func @transform_3(%arg0: i32, %arg1: i32) -> (i32, i32) {
    %c0_i32 = arith.constant 0 : i32
    %c0_i32_0 = arith.constant 0 : i32
    %c0_i32_1 = arith.constant 0 : i32
    return %c0_i32, %c0_i32_0 : i32, i32
  }
  func.func @transform_4(%arg0: i32, %arg1: i32) -> (i32, i32) {
    %c0_i32 = arith.constant 0 : i32
    %c0_i32_0 = arith.constant 0 : i32
    %c0_i32_1 = arith.constant 0 : i32
    return %c0_i32, %c0_i32_0 : i32, i32
  }
  func.func @transform_5(%arg0: i32, %arg1: i32) -> (i32, i32) {
    %c0_i32 = arith.constant 0 : i32
    %c0_i32_0 = arith.constant 0 : i32
    return %arg0, %c0_i32 : i32, i32
  }
}

module attributes {stable_mosaic.version = 11 : i64} {
  func.func @gcn2_kernel(%arg0: i32, %arg1: i32, %arg2: memref<128x128xbf16, #tpu.memory_space<vmem>>, %arg3: memref<384x128xbf16, #tpu.memory_space<vmem>>, %arg4: memref<128x1xf32, #tpu.memory_space<vmem>>, %arg5: memref<1x128xf32, #tpu.memory_space<vmem>>, %arg6: memref<128x128xbf16, #tpu.memory_space<vmem>>, %arg7: memref<1x128xf32, #tpu.memory_space<vmem>>, %arg8: memref<128x128xbf16, #tpu.memory_space<vmem>>, %arg9: memref<1x128xf32, #tpu.memory_space<vmem>>, %arg10: memref<128x128xf32, #tpu.memory_space<vmem>>, %arg11: memref<128x128xf32, #tpu.memory_space<vmem>>) attributes {dimension_semantics = [#tpu.dimension_semantics<parallel>, #tpu.dimension_semantics<arbitrary>], iteration_bounds = array<i64: 3, 3>, scalar_prefetch = 0 : i64, scratch_operands = 1 : i64, tpu.core_type = #tpu.core_type<tc>, window_params = [{transform_indices = @transform_0, window_bounds = array<i64: 128, 128>}, {pipeline_mode = #tpu.pipeline_mode<synchronous>, transform_indices = @transform_1, window_bounds = array<i64: 384, 128>}, {transform_indices = @transform_2, window_bounds = array<i64: 128, 1>}, {pipeline_mode = #tpu.pipeline_mode<synchronous>, transform_indices = @transform_3, window_bounds = array<i64: 1, 128>}, {pipeline_mode = #tpu.pipeline_mode<synchronous>, transform_indices = @transform_4, window_bounds = array<i64: 128, 128>}, {pipeline_mode = #tpu.pipeline_mode<synchronous>, transform_indices = @transform_5, window_bounds = array<i64: 1, 128>}, {pipeline_mode = #tpu.pipeline_mode<synchronous>, transform_indices = @transform_6, window_bounds = array<i64: 128, 128>}, {pipeline_mode = #tpu.pipeline_mode<synchronous>, transform_indices = @transform_7, window_bounds = array<i64: 1, 128>}, {transform_indices = @transform_8, window_bounds = array<i64: 128, 128>}]} {
    %c0_i32 = arith.constant 0 : i32
    %0 = arith.cmpi eq, %arg1, %c0_i32 : i32
    %1 = arith.extui %0 : i1 to i32
    %c0_i32_0 = arith.constant 0 : i32
    %2 = arith.cmpi ne, %1, %c0_i32_0 : i32
    scf.if %2 {
      %cst_8 = arith.constant 0.000000e+00 : f32
      %15 = vector.broadcast %cst_8 : f32 to vector<128x128xf32>
      %c0_9 = arith.constant 0 : index
      %c0_10 = arith.constant 0 : index
      %16 = vector.load %arg11[%c0_9, %c0_10] : memref<128x128xf32, #tpu.memory_space<vmem>>, vector<128x128xf32>
      tpu.vector_store %arg11[%c0_9, %c0_10], %15 {strides = array<i32>} : memref<128x128xf32, #tpu.memory_space<vmem>>, vector<128x128xf32>,
    } else {
    }
    %c128_i32 = arith.constant 128 : i32
    %3 = arith.muli %arg1, %c128_i32 : i32
    %4 = tpu.assume_multiple %3, 128 : i32
    %c0 = arith.constant 0 : index
    %c0_1 = arith.constant 0 : index
    %5 = vector.load %arg11[%c0, %c0_1] : memref<128x128xf32, #tpu.memory_space<vmem>>, vector<128x128xf32>
    %c0_2 = arith.constant 0 : index
    %c0_3 = arith.constant 0 : index
    %6 = vector.load %arg2[%c0_2, %c0_3] : memref<128x128xbf16, #tpu.memory_space<vmem>>, vector<128x128xbf16>
    %7 = arith.index_cast %4 : i32 to index
    %c0_4 = arith.constant 0 : index
    %8 = vector.load %arg3[%7, %c0_4] : memref<384x128xbf16, #tpu.memory_space<vmem>>, vector<128x128xbf16>
    %cst = arith.constant dense<0.000000e+00> : vector<128x128xf32>
    %9 = tpu.matmul %6, %8, %cst {dimension_numbers = #tpu.dot_dimension_numbers<[1], [0], [0], [1], [0, 0, 1, 1], [], []>} : vector<128x128xbf16>, vector<128x128xbf16>, vector<128x128xf32> -> vector<128x128xf32>
    %10 = arith.addf %5, %9 : vector<128x128xf32>
    %c0_5 = arith.constant 0 : index
    %c0_6 = arith.constant 0 : index
    %11 = vector.load %arg11[%c0_5, %c0_6] : memref<128x128xf32, #tpu.memory_space<vmem>>, vector<128x128xf32>
    tpu.vector_store %arg11[%c0_5, %c0_6], %10 {strides = array<i32>} : memref<128x128xf32, #tpu.memory_space<vmem>>, vector<128x128xf32>,
    %c2_i32 = arith.constant 2 : i32
    %12 = arith.cmpi eq, %arg1, %c2_i32 : i32
    %13 = arith.extui %12 : i1 to i32
    %c0_i32_7 = arith.constant 0 : i32
    %14 = arith.cmpi ne, %13, %c0_i32_7 : i32
    scf.if %14 {
      %c0_8 = arith.constant 0 : index
      %c0_9 = arith.constant 0 : index
      %15 = vector.load %arg4[%c0_8, %c0_9] : memref<128x1xf32, #tpu.memory_space<vmem>>, vector<128x1xf32>
      %c0_10 = arith.constant 0 : index
      %c0_11 = arith.constant 0 : index
      %16 = vector.load %arg11[%c0_10, %c0_11] : memref<128x128xf32, #tpu.memory_space<vmem>>, vector<128x128xf32>
      %17 = vector.broadcast %15 : vector<128x1xf32> to vector<128x128xf32>
      %18 = arith.mulf %17, %16 : vector<128x128xf32>
      %c0_12 = arith.constant 0 : index
      %c0_13 = arith.constant 0 : index
      %19 = vector.load %arg5[%c0_12, %c0_13] : memref<1x128xf32, #tpu.memory_space<vmem>>, vector<1x128xf32>
      %20 = vector.broadcast %19 : vector<1x128xf32> to vector<128x128xf32>
      %21 = arith.addf %18, %20 : vector<128x128xf32>
      %22 = arith.truncf %21 : vector<128x128xf32> to vector<128x128xbf16>
      %c0_14 = arith.constant 0 : index
      %c0_15 = arith.constant 0 : index
      %23 = vector.load %arg6[%c0_14, %c0_15] : memref<128x128xbf16, #tpu.memory_space<vmem>>, vector<128x128xbf16>
      %cst_16 = arith.constant dense<0.000000e+00> : vector<128x128xf32>
      %24 = tpu.matmul %22, %23, %cst_16 {dimension_numbers = #tpu.dot_dimension_numbers<[1], [0], [0], [1], [0, 0, 1, 1], [], []>} : vector<128x128xbf16>, vector<128x128xbf16>, vector<128x128xf32> -> vector<128x128xf32>
      %c0_17 = arith.constant 0 : index
      %c0_18 = arith.constant 0 : index
      %25 = vector.load %arg7[%c0_17, %c0_18] : memref<1x128xf32, #tpu.memory_space<vmem>>, vector<1x128xf32>
      %26 = vector.broadcast %25 : vector<1x128xf32> to vector<128x128xf32>
      %27 = arith.addf %24, %26 : vector<128x128xf32>
      %cst_19 = arith.constant 0.000000e+00 : f32
      %28 = vector.broadcast %cst_19 : f32 to vector<128x128xf32>
      %29 = arith.cmpf ogt, %27, %28 : vector<128x128xf32>
      %cst_20 = arith.constant 0.00999999977 : f32
      %30 = vector.broadcast %cst_20 : f32 to vector<128x128xf32>
      %31 = arith.mulf %30, %27 : vector<128x128xf32>
      %32 = arith.select %29, %27, %31 : vector<128x128xi1>, vector<128x128xf32>
      %33 = arith.truncf %32 : vector<128x128xf32> to vector<128x128xbf16>
      %c0_21 = arith.constant 0 : index
      %c0_22 = arith.constant 0 : index
      %34 = vector.load %arg8[%c0_21, %c0_22] : memref<128x128xbf16, #tpu.memory_space<vmem>>, vector<128x128xbf16>
      %cst_23 = arith.constant dense<0.000000e+00> : vector<128x128xf32>
      %35 = tpu.matmul %33, %34, %cst_23 {dimension_numbers = #tpu.dot_dimension_numbers<[1], [0], [0], [1], [0, 0, 1, 1], [], []>} : vector<128x128xbf16>, vector<128x128xbf16>, vector<128x128xf32> -> vector<128x128xf32>
      %c0_24 = arith.constant 0 : index
      %c0_25 = arith.constant 0 : index
      %36 = vector.load %arg9[%c0_24, %c0_25] : memref<1x128xf32, #tpu.memory_space<vmem>>, vector<1x128xf32>
      %37 = vector.broadcast %36 : vector<1x128xf32> to vector<128x128xf32>
      %38 = arith.addf %35, %37 : vector<128x128xf32>
      %c0_26 = arith.constant 0 : index
      %c0_27 = arith.constant 0 : index
      %39 = vector.load %arg10[%c0_26, %c0_27] : memref<128x128xf32, #tpu.memory_space<vmem>>, vector<128x128xf32>
      tpu.vector_store %arg10[%c0_26, %c0_27], %38 {strides = array<i32>} : memref<128x128xf32, #tpu.memory_space<vmem>>, vector<128x128xf32>,
    } else {
    }
    return
  }
  func.func @transform_0(%arg0: i32, %arg1: i32) -> (i32, i32) {
    %c0_i32 = arith.constant 0 : i32
    return %arg0, %arg1 : i32, i32
  }
  func.func @transform_1(%arg0: i32, %arg1: i32) -> (i32, i32) {
    %c0_i32 = arith.constant 0 : i32
    %c0_i32_0 = arith.constant 0 : i32
    %c0_i32_1 = arith.constant 0 : i32
    return %c0_i32, %c0_i32_0 : i32, i32
  }
  func.func @transform_2(%arg0: i32, %arg1: i32) -> (i32, i32) {
    %c0_i32 = arith.constant 0 : i32
    %c0_i32_0 = arith.constant 0 : i32
    return %arg0, %c0_i32 : i32, i32
  }
  func.func @transform_3(%arg0: i32, %arg1: i32) -> (i32, i32) {
    %c0_i32 = arith.constant 0 : i32
    %c0_i32_0 = arith.constant 0 : i32
    %c0_i32_1 = arith.constant 0 : i32
    return %c0_i32, %c0_i32_0 : i32, i32
  }
  func.func @transform_4(%arg0: i32, %arg1: i32) -> (i32, i32) {
    %c0_i32 = arith.constant 0 : i32
    %c0_i32_0 = arith.constant 0 : i32
    %c0_i32_1 = arith.constant 0 : i32
    return %c0_i32, %c0_i32_0 : i32, i32
  }
  func.func @transform_5(%arg0: i32, %arg1: i32) -> (i32, i32) {
    %c0_i32 = arith.constant 0 : i32
    %c0_i32_0 = arith.constant 0 : i32
    %c0_i32_1 = arith.constant 0 : i32
    return %c0_i32, %c0_i32_0 : i32, i32
  }
  func.func @transform_6(%arg0: i32, %arg1: i32) -> (i32, i32) {
    %c0_i32 = arith.constant 0 : i32
    %c0_i32_0 = arith.constant 0 : i32
    %c0_i32_1 = arith.constant 0 : i32
    return %c0_i32, %c0_i32_0 : i32, i32
  }
  func.func @transform_7(%arg0: i32, %arg1: i32) -> (i32, i32) {
    %c0_i32 = arith.constant 0 : i32
    %c0_i32_0 = arith.constant 0 : i32
    %c0_i32_1 = arith.constant 0 : i32
    return %c0_i32, %c0_i32_0 : i32, i32
  }
  func.func @transform_8(%arg0: i32, %arg1: i32) -> (i32, i32) {
    %c0_i32 = arith.constant 0 : i32
    %c0_i32_0 = arith.constant 0 : i32
    return %arg0, %c0_i32 : i32, i32
  }
}

</mosaic_0001>

<bundles_post_ra>
// kernel: botgcn_single.3
= control target key start
LH: loop header
LB: loop body
LE: loop exit
PB: predicated region body
PF: predicated region fallthrough
CT: control target
= control target key end

     0   :  { %s1346_s24 = smov 0   ;;  %s1516_s0 = inlined_call_operand.vmem [shape: bf16[384,128], index: 0, kind: input, shape index: {}]   ;;  %s1517_s1 = inlined_call_operand.vmem [shape: f32[384,1], index: 1, kind: input, shape index: {}]   ;;  %s1518_s2 = inlined_call_operand.vmem [shape: bf16[128,128], index: 2, kind: input, shape index: {}]   ;;  %s1519_s3 = inlined_call_operand.vmem [shape: f32[1,128], index: 3, kind: input, shape index: {}]   ;;  %s1520_s4 = inlined_call_operand.vmem [shape: bf16[128,128], index: 4, kind: input, shape index: {}]   ;;  %s1521_s5 = inlined_call_operand.vmem [shape: f32[1,128], index: 5, kind: input, shape index: {}]   ;;  %s1522_s6 = inlined_call_operand.vmem [shape: bf16[128,128], index: 6, kind: input, shape index: {}]   ;;  %s1523_s7 = inlined_call_operand.vmem [shape: bf16[384,128], index: 7, kind: output, shape index: {}]  }
   0x1 LB: > { %s1039_s25 = sadd.s32 4294967295, %s1303_s24   ;;  %p1043_p0 = scmp.ge.s32.totalorder %s1303_s24, 1  ;;  %s1303_s24 = sphi %s1346_s24, %s17_s24  }
   0x2   : > { %p249_p1 = scmp.lt.s32.totalorder %s1303_s24, 4 }
   0x4   : > { %p250_p2 = pnand %p1043_p0, %p249_p1 }
   0x5   : > { %s1044_s11 = sshll.u32 (!%p250_p2), %s1039_s25, 4 }
   0x6   : > { %253 = sbr.rel (%p250_p2) target bundleno = 550 (0x226), region = 48  ;;  %p287_p3 = scmp.lt.s32.totalorder (!%p250_p2), %s1044_s11, 47 }
   0xb   : > { %v1195_v0 = vld [vmem:[%s1518_s2 + $0x38] sm:$0xff]  ;;  %v1194_v1 = vld [vmem:[%s1518_s2 + $0x30] sm:$0xff]  ;;  %v1193_v2 = vld [vmem:[%s1518_s2 + $0x28] sm:$0xff]  ;;  %s1525_s11 = smov (!%p287_p3, %s1044_s11), 47 }
   0xc   : > { %436 = vmatpush.bf16.msra.mxu0 %v1195_v0  ;;  %1259 = vmatpush.bf16.msra.mxu3 %v1195_v0  ;;  %v1192_v3 = vld [vmem:[%s1518_s2 + $0x20] sm:$0xff]  ;;  %v1191_v4 = vld [vmem:[%s1518_s2 + $0x18] sm:$0xff]  ;;  %v1190_v5 = vld [vmem:[%s1518_s2 + $0x10] sm:$0xff]  ;;  %s1045_s18 = sshll.u32 %s1525_s11, 2  ;;  %s1047_s17 = sshll.u32 %s1525_s11, 3 }
   0xd   : > { %v1189_v6 = vld [vmem:[%s1518_s2 + $0x8] sm:$0xff]  ;;  %v1188_v7 = vld [vmem:[%s1518_s2] sm:$0xff]  ;;  %s290_s23 = scalar_lea.vmem %s1516_s0, %s1045_s18  ;;  %v1203_v14 = vld [vmem:[%s1520_s4 + $0x38] sm:$0xff]  ;;  %s1459_s21 = scalar_lea.vmem %s1517_s1, %s1047_s17 }
   0xe   : > { %v1180_v8 = vld [vmem:[%s290_s23] sm:$0xff]  ;;  %v1186_v9 = vld [vmem:[%s290_s23 + $0x30] sm:$0xff]  ;;  %v1181_v10 = vld [vmem:[%s290_s23 + $0x8] sm:$0xff]  ;;  %609 = vmatpush.bf16.msra.mxu1 %v1203_v14  ;;  %s1503_s27 = scalar_lea.vmem %s1523_s7, %s1045_s18 }
   0xf   : > { %v1187_v11 = vld [vmem:[%s290_s23 + $0x38] sm:$0xff]  ;;  %v1182_v12 = vld [vmem:[%s290_s23 + $0x10] sm:$0xff]  ;;  %v1201_v16 = vld [vmem:[%s1520_s4 + $0x28] sm:$0xff] }
  0x10   : > { %437 = vmatpush.bf16.msra.mxu0 %v1194_v1  ;;  %1260 = vmatpush.bf16.msra.mxu3 %v1194_v1  ;;  %v1183_v13 = vld [vmem:[%s290_s23 + $0x18] sm:$0xff]  ;;  %v1202_v15 = vld [vmem:[%s1520_s4 + $0x30] sm:$0xff]  ;;  %v1200_v17 = vld [vmem:[%s1520_s4 + $0x20] sm:$0xff] }
  0x11   : > { %v1184_v18 = vld [vmem:[%s290_s23 + $0x20] sm:$0xff]  ;;  %v1185_v19 = vld [vmem:[%s290_s23 + $0x28] sm:$0xff]  ;;  %v1199_v20 = vld [vmem:[%s1520_s4 + $0x18] sm:$0xff] }
  0x12   : > { %610 = vmatpush.bf16.msra.mxu1 %v1202_v15  ;;  %v1198_v21 = vld [vmem:[%s1520_s4 + $0x10] sm:$0xff]  ;;  %v1197_v22 = vld [vmem:[%s1520_s4 + $0x8] sm:$0xff]  ;;  %v1196_v23 = vld [vmem:[%s1520_s4] sm:$0xff] }
  0x13   : > { %v1413_v25 = vld [vmem:[%s1519_s3] ss:$0 sm:$0xff] }
  0x14   : > { %438 = vmatpush.bf16.msra.mxu0 %v1193_v2  ;;  %1261 = vmatpush.bf16.msra.mxu3 %v1193_v2 }
  0x16   : > { %611 = vmatpush.bf16.msra.mxu1 %v1201_v16 }
  0x18   : > { %439 = vmatpush.bf16.msra.mxu0 %v1192_v3  ;;  %1262 = vmatpush.bf16.msra.mxu3 %v1192_v3 }
  0x1a   : > { %612 = vmatpush.bf16.msra.mxu1 %v1200_v17 }
  0x1c   : > { %440 = vmatpush.bf16.msra.mxu0 %v1191_v4  ;;  %1263 = vmatpush.bf16.msra.mxu3 %v1191_v4 }
  0x1e   : > { %613 = vmatpush.bf16.msra.mxu1 %v1199_v20 }
  0x20   : > { %441 = vmatpush.bf16.msra.mxu0 %v1190_v5  ;;  %1264 = vmatpush.bf16.msra.mxu3 %v1190_v5 }
  0x22   : > { %614 = vmatpush.bf16.msra.mxu1 %v1198_v21 }
  0x24   : > { %442 = vmatpush.bf16.msra.mxu0 %v1189_v6  ;;  %1265 = vmatpush.bf16.msra.mxu3 %v1189_v6 }
  0x26   : > { %615 = vmatpush.bf16.msra.mxu1 %v1197_v22 }
  0x28   : > { %443 = vmatpush.bf16.msra.mxu0 %v1188_v7  ;;  %1266 = vmatpush.bf16.msra.mxu3 %v1188_v7 }
  0x2a   : > { %616 = vmatpush.bf16.msra.mxu1 %v1196_v23 }
  0x2b   : > { %444 = vmatmul.bf16.vlgmr.msra.gmra.mxu0 %v1180_v8  ;;  %474 = vmatmul.bf16.vlgmr.msra.gmra.mxu3 %v1186_v9 }
  0x2c   : > { %1267 = vmatpush.bf16.msrb.mxu3 %v1203_v14 }
  0x30   : > { %1268 = vmatpush.bf16.msrb.mxu3 %v1202_v15 }
  0x34   : > { %1269 = vmatpush.bf16.msrb.mxu3 %v1201_v16  ;;  %v1211_v16 = vld [vmem:[%s1522_s6 + $0x38] sm:$0xff] }
  0x35   : > { %794 = vmatpush.bf16.msra.mxu2 %v1211_v16 }
  0x38   : > { %1270 = vmatpush.bf16.msrb.mxu3 %v1200_v17  ;;  %v1210_v17 = vld [vmem:[%s1522_s6 + $0x30] sm:$0xff] }
  0x39   : > { %795 = vmatpush.bf16.msra.mxu2 %v1210_v17 }
  0x3b   : > { %449 = vmatmul.bf16.gmra.mxu0 %v1181_v10  ;;  %479 = vmatmul.bf16.gmra.mxu3 %v1187_v11 }
  0x3c   : > { %1271 = vmatpush.bf16.msrb.mxu3 %v1199_v20 }
  0x40   : > { %1272 = vmatpush.bf16.msrb.mxu3 %v1198_v21 }
  0x44   : > { %1273 = vmatpush.bf16.msrb.mxu3 %v1197_v22 }
  0x48   : > { %1274 = vmatpush.bf16.msrb.mxu3 %v1196_v23  ;;  %v1208_v23 = vld [vmem:[%s1522_s6 + $0x20] sm:$0xff] }
  0x4b   : > { %454 = vmatmul.bf16.gmra.mxu0 %v1182_v12 }
  0x4c   : > { %1275 = vmatpush.bf16.msra.mxu3 %v1211_v16 }
  0x50   : > { %1276 = vmatpush.bf16.msra.mxu3 %v1210_v17  ;;  %v716_v17 = vld [vmem:[%s1459_s21 + $0x50] sm:$0xff] }
  0x5b   : > { %459 = vmatmul.bf16.gmra.mxu0 %v1183_v13 }
  0x6b   : > { %464 = vmatmul.bf16.gmra.mxu0 %v1184_v18 }
  0x7b   : > { %469 = vmatmul.bf16.gmra.mxu0 %v1185_v19  ;;  %v1209_v19 = vld [vmem:[%s1522_s6 + $0x28] sm:$0xff] }
  0x7c   : > { %796 = vmatpush.bf16.msra.mxu2 %v1209_v19  ;;  %1277 = vmatpush.bf16.msra.mxu3 %v1209_v19 }
  0x80   : > { %797 = vmatpush.bf16.msra.mxu2 %v1208_v23  ;;  %1278 = vmatpush.bf16.msra.mxu3 %v1208_v23 }
  0xa8   : > { %v445_v24 = vpop.f32.mrf.mxu0 }
  0xa9   : > { %v446_v26 = vadd.f32 %v1413_v25, %v445_v24 }
  0xab   : > { %v501_v29 = vmul.f32 0.01, %v446_v26  ;;  %vm485_vm0 = vcmp.gt.f32.partialorder %v446_v26, 0.0 }
  0xad   : > { %v517_v33 = vsel %vm485_vm0, %v446_v26, %v501_v29 }
  0xae   : > { %v475_v27 = vpop.f32.mrf.mxu3 }
  0xaf   : > { %v476_v31 = vadd.f32 %v1413_v25, %v475_v27 }
  0xb0   : > { %v447_v28 = vpop.f32.mrf.mxu0 }
  0xb1   : > { %v448_v30 = vadd.f32 %v1413_v25, %v447_v28  ;;  %v513_v35 = vmul.f32 0.01, %v476_v31  ;;  %vm497_vm2 = vcmp.gt.f32.partialorder %v476_v31, 0.0 }
  0xb3   : > { %v502_v32 = vmul.f32 0.01, %v448_v30  ;;  %vm486_vm1 = vcmp.gt.f32.partialorder %v448_v30, 0.0  ;;  %v529_v41 = vsel %vm497_vm2, %v476_v31, %v513_v35 }
  0xb5   : > { %v518_v34 = vsel %vm486_vm1, %v448_v30, %v502_v32 }
  0xb6   : > { %v533_v36 = vpack.c.bf16 %v518_v34, %v517_v33  ;;  %v477_v37 = vpop.f32.mrf.mxu3 }
  0xb7   : > { %v478_v38 = vadd.f32 %v1413_v25, %v477_v37 }
  0xb8   : > { %v450_v39 = vpop.f32.mrf.mxu0  ;;  %617 = vmatmul.bf16.vlgmr.msra.gmra.mxu1 %v533_v36 }
  0xb9   : > { %vm498_vm3 = vcmp.gt.f32.partialorder %v478_v38, 0.0  ;;  %v514_v40 = vmul.f32 0.01, %v478_v38  ;;  %v451_v44 = vadd.f32 %v1413_v25, %v450_v39  ;;  %v1206_v39 = vld [vmem:[%s1522_s6 + $0x10] sm:$0xff] }
  0xbb   : > { %v530_v42 = vsel %vm498_vm3, %v478_v38, %v514_v40  ;;  %v503_v47 = vmul.f32 0.01, %v451_v44  ;;  %vm487_vm4 = vcmp.gt.f32.partialorder %v451_v44, 0.0  ;;  %v1207_v38 = vld [vmem:[%s1522_s6 + $0x18] sm:$0xff]  ;;  %v1204_v40 = vld [vmem:[%s1522_s6] sm:$0xff] }
  0xbc   : > { %v539_v43 = vpack.c.bf16 %v530_v42, %v529_v41  ;;  %798 = vmatpush.bf16.msra.mxu2 %v1207_v38  ;;  %1279 = vmatpush.bf16.msra.mxu3 %v1207_v38  ;;  %v1305_v41 = vmov 0   ;;  %v721_v38 = vld [vmem:[%s1459_s21 + $0x78] sm:$0xff] }
  0xbd   : > { %v519_v51 = vsel %vm487_vm4, %v451_v44, %v503_v47  ;;  %1292 = vset.pattern.permute.xlu0 %v1305_v41  ;;  %1293 = vset.pattern.permute.xlu1 %v1305_v41  ;;  %v1465_v44 = vld [vmem:[%s1521_s5] ss:$0 sm:$0xff]  ;;  %v707_v47 = vld [vmem:[%s1459_s21 + $0x8] sm:$0xff] }
  0xbe   : > { %v480_v45 = vpop.f32.mrf.mxu3  ;;  %647 = vmatmul.bf16.vlgmr.msrb.gmra.mxu3 %v539_v43  ;;  %1294 = vset.pattern.permute.xlu2 %v1305_v41  ;;  %v706_v43 = vld [vmem:[%s1459_s21] sm:$0xff] }
  0xbf   : > { %v481_v49 = vadd.f32 %v1413_v25, %v480_v45  ;;  %845 = vperm.xlu0 %1292, %v706_v43  }
  0xc0   : > { %v452_v46 = vpop.f32.mrf.mxu0  ;;  %799 = vmatpush.bf16.msra.mxu2 %v1206_v39  ;;  %1280 = vmatpush.bf16.msra.mxu3 %v1206_v39 }
  0xc1   : > { %v453_v48 = vadd.f32 %v1413_v25, %v452_v46  ;;  %v515_v53 = vmul.f32 0.01, %v481_v49  ;;  %vm499_vm6 = vcmp.gt.f32.partialorder %v481_v49, 0.0 }
  0xc3   : > { %v504_v50 = vmul.f32 0.01, %v453_v48  ;;  %vm488_vm5 = vcmp.gt.f32.partialorder %v453_v48, 0.0  ;;  %v531_v59 = vsel %vm499_vm6, %v481_v49, %v515_v53 }
  0xc5   : > { %v520_v52 = vsel %vm488_vm5, %v453_v48, %v504_v50 }
  0xc6   : > { %v534_v54 = vpack.c.bf16 %v520_v52, %v519_v51  ;;  %v482_v55 = vpop.f32.mrf.mxu3  ;;  %v708_v51 = vld [vmem:[%s1459_s21 + $0x10] sm:$0xff] }
  0xc7   : > { %v483_v56 = vadd.f32 %v1413_v25, %v482_v55  ;;  %850 = vperm.xlu0 %1292, %v707_v47   ;;  %855 = vperm.xlu1 %1293, %v708_v51   ;;  %v720_v51 = vld [vmem:[%s1459_s21 + $0x70] sm:$0xff] }
  0xc8   : > { %v455_v57 = vpop.f32.mrf.mxu0  ;;  %622 = vmatmul.bf16.gmra.mxu1 %v534_v54 }
  0xc9   : > { %v516_v58 = vmul.f32 0.01, %v483_v56  ;;  %vm500_vm7 = vcmp.gt.f32.partialorder %v483_v56, 0.0  ;;  %v456_v62 = vadd.f32 %v1413_v25, %v455_v57 }
  0xcb   : > { %v532_v60 = vsel %vm500_vm7, %v483_v56, %v516_v58  ;;  %v505_v0 = vmul.f32 0.01, %v456_v62  ;;  %vm489_vm8 = vcmp.gt.f32.partialorder %v456_v62, 0.0 }
  0xcc   : > { %v540_v61 = vpack.c.bf16 %v532_v60, %v531_v59  ;;  %v709_v59 = vld [vmem:[%s1459_s21 + $0x18] sm:$0xff] }
  0xcd   : > { %v521_v3 = vsel %vm489_vm8, %v456_v62, %v505_v0 }
  0xce   : > { %652 = vmatmul.bf16.gmra.mxu3 %v540_v61 }
  0xcf   : > { %860 = vperm.xlu1 %1293, %v709_v59  }
  0xd0   : > { %v457_v63 = vpop.f32.mrf.mxu0 }
  0xd1   : > { %v458_v1 = vadd.f32 %v1413_v25, %v457_v63 }
  0xd3   : > { %v506_v2 = vmul.f32 0.01, %v458_v1  ;;  %vm490_vm9 = vcmp.gt.f32.partialorder %v458_v1, 0.0 }
  0xd5   : > { %v522_v4 = vsel %vm490_vm9, %v458_v1, %v506_v2  ;;  %v712_v2 = vld [vmem:[%s1459_s21 + $0x30] sm:$0xff] }
  0xd6   : > { %v535_v5 = vpack.c.bf16 %v522_v4, %v521_v3  ;;  %875 = vperm.xlu0 %1292, %v712_v2  }
  0xd8   : > { %v460_v6 = vpop.f32.mrf.mxu0  ;;  %627 = vmatmul.bf16.gmra.mxu1 %v535_v5 }
  0xd9   : > { %v461_v7 = vadd.f32 %v1413_v25, %v460_v6 }
  0xdb   : > { %v507_v9 = vmul.f32 0.01, %v461_v7  ;;  %vm491_vm10 = vcmp.gt.f32.partialorder %v461_v7, 0.0 }
  0xdd   : > { %v523_v12 = vsel %vm491_vm10, %v461_v7, %v507_v9 }
  0xe0   : > { %v462_v8 = vpop.f32.mrf.mxu0 }
  0xe1   : > { %v463_v10 = vadd.f32 %v1413_v25, %v462_v8  ;;  %v713_v8 = vld [vmem:[%s1459_s21 + $0x38] sm:$0xff] }
  0xe2   : > { %880 = vperm.xlu1 %1293, %v713_v8  }
  0xe3   : > { %v508_v11 = vmul.f32 0.01, %v463_v10  ;;  %vm492_vm11 = vcmp.gt.f32.partialorder %v463_v10, 0.0 }
  0xe5   : > { %v524_v13 = vsel %vm492_vm11, %v463_v10, %v508_v11 }
  0xe6   : > { %v536_v14 = vpack.c.bf16 %v524_v13, %v523_v12 }
  0xe8   : > { %v465_v15 = vpop.f32.mrf.mxu0  ;;  %632 = vmatmul.bf16.gmra.mxu1 %v536_v14 }
  0xe9   : > { %v466_v18 = vadd.f32 %v1413_v25, %v465_v15  ;;  %v715_v15 = vld [vmem:[%s1459_s21 + $0x48] sm:$0xff] }
  0xea   : > { %890 = vperm.xlu0 %1292, %v715_v15   ;;  %895 = vperm.xlu1 %1293, %v716_v17  }
  0xeb   : > { %v509_v21 = vmul.f32 0.01, %v466_v18  ;;  %vm493_vm12 = vcmp.gt.f32.partialorder %v466_v18, 0.0 }
  0xed   : > { %v525_v26 = vsel %vm493_vm12, %v466_v18, %v509_v21 }
  0xf0   : > { %v467_v20 = vpop.f32.mrf.mxu0 }
  0xf1   : > { %v468_v22 = vadd.f32 %v1413_v25, %v467_v20 }
  0xf3   : > { %v510_v24 = vmul.f32 0.01, %v468_v22  ;;  %vm494_vm13 = vcmp.gt.f32.partialorder %v468_v22, 0.0 }
  0xf5   : > { %v526_v27 = vsel %vm494_vm13, %v468_v22, %v510_v24  ;;  %v710_v24 = vld [vmem:[%s1459_s21 + $0x20] sm:$0xff] }
  0xf6   : > { %v537_v28 = vpack.c.bf16 %v526_v27, %v525_v26  ;;  %v718_v26 = vld [vmem:[%s1459_s21 + $0x60] sm:$0xff]  ;;  %865 = vperm.xlu2 %1294, %v710_v24  }
  0xf7   : > { %905 = vperm.xlu0 %1292, %v718_v26  }
  0xf8   : > { %v470_v29 = vpop.f32.mrf.mxu0  ;;  %637 = vmatmul.bf16.gmra.mxu1 %v537_v28 }
  0xf9   : > { %v471_v30 = vadd.f32 %v1413_v25, %v470_v29 }
  0xfb   : > { %v511_v32 = vmul.f32 0.01, %v471_v30  ;;  %vm495_vm14 = vcmp.gt.f32.partialorder %v471_v30, 0.0 }
  0xfd   : > { %v527_v35 = vsel %vm495_vm14, %v471_v30, %v511_v32  ;;  %v719_v32 = vld [vmem:[%s1459_s21 + $0x68] sm:$0xff] }
  0xfe   : > { %910 = vperm.xlu1 %1293, %v719_v32  }
  0xff   : > { %920 = vperm.xlu0 %1292, %v721_v38  }
 0x100   : > { %v472_v31 = vpop.f32.mrf.mxu0 }
 0x101   : > { %v473_v33 = vadd.f32 %v1413_v25, %v472_v31  ;;  %v1205_v25 = vld [vmem:[%s1522_s6 + $0x8] sm:$0xff] }
 0x102   : > { %800 = vmatpush.bf16.msra.mxu2 %v1205_v25  ;;  %1281 = vmatpush.bf16.msra.mxu3 %v1205_v25 }
 0x103   : > { %v512_v34 = vmul.f32 0.01, %v473_v33  ;;  %vm496_vm15 = vcmp.gt.f32.partialorder %v473_v33, 0.0 }
 0x105   : > { %v528_v36 = vsel %vm496_vm15, %v473_v33, %v512_v34 }
 0x106   : > { %v538_v37 = vpack.c.bf16 %v528_v36, %v527_v35  ;;  %801 = vmatpush.bf16.msra.mxu2 %v1204_v40  ;;  %1282 = vmatpush.bf16.msra.mxu3 %v1204_v40  ;;  %v714_v40 = vld [vmem:[%s1459_s21 + $0x40] sm:$0xff] }
 0x108   : > { %642 = vmatmul.bf16.gmra.mxu1 %v538_v37  ;;  %v711_v37 = vld [vmem:[%s1459_s21 + $0x28] sm:$0xff] }
 0x109   : > { %870 = vperm.xlu2 %1294, %v711_v37  }
 0x111   : > { %885 = vperm.xlu2 %1294, %v714_v40  }
 0x135   : > { %v618_v42 = vpop.f32.mrf.mxu1 }
 0x136   : > { %v619_v45 = vadd.f32 %v1465_v44, %v618_v42 }
 0x138   : > { %v674_v48 = vmul.f32 0.01, %v619_v45  ;;  %vm658_vm0 = vcmp.gt.f32.partialorder %v619_v45, 0.0 }
 0x13a   : > { %v690_v53 = vsel %vm658_vm0, %v619_v45, %v674_v48 }
 0x13d   : > { %v620_v46 = vpop.f32.mrf.mxu1 }
 0x13e   : > { %v621_v49 = vadd.f32 %v1465_v44, %v620_v46 }
 0x140   : > { %v675_v50 = vmul.f32 0.01, %v621_v49  ;;  %vm659_vm1 = vcmp.gt.f32.partialorder %v621_v49, 0.0 }
 0x141   : > { %v648_v52 = vpop.f32.mrf.mxu3 }
 0x142   : > { %v691_v54 = vsel %vm659_vm1, %v621_v49, %v675_v50  ;;  %v649_v56 = vadd.f32 %v1465_v44, %v648_v52  ;;  %v717_v49 = vld [vmem:[%s1459_s21 + $0x58] sm:$0xff] }
 0x143   : > { %v722_v55 = vpack.c.bf16 %v691_v54, %v690_v53  ;;  %900 = vperm.xlu2 %1294, %v717_v49  }
 0x144   : > { %v686_v58 = vmul.f32 0.01, %v649_v56  ;;  %vm670_vm2 = vcmp.gt.f32.partialorder %v649_v56, 0.0 }
 0x145   : > { %v623_v57 = vpop.f32.mrf.mxu1  ;;  %802 = vmatmul.bf16.vlgmr.msra.gmra.mxu2 %v722_v55 }
 0x146   : > { %v624_v61 = vadd.f32 %v1465_v44, %v623_v57  ;;  %v702_v63 = vsel %vm670_vm2, %v649_v56, %v686_v58 }
 0x148   : > { %v676_v3 = vmul.f32 0.01, %v624_v61  ;;  %vm660_vm4 = vcmp.gt.f32.partialorder %v624_v61, 0.0 }
 0x149   : > { %v650_v60 = vpop.f32.mrf.mxu3 }
 0x14a   : > { %v651_v62 = vadd.f32 %v1465_v44, %v650_v60  ;;  %v692_v10 = vsel %vm660_vm4, %v624_v61, %v676_v3 }
 0x14b   : > { %915 = vperm.xlu2 %1294, %v720_v51  }
 0x14c   : > { %vm671_vm3 = vcmp.gt.f32.partialorder %v651_v62, 0.0  ;;  %v687_v0 = vmul.f32 0.01, %v651_v62 }
 0x14d   : > { %v625_v1 = vpop.f32.mrf.mxu1 }
 0x14e   : > { %v626_v4 = vadd.f32 %v1465_v44, %v625_v1  ;;  %v703_v5 = vsel %vm671_vm3, %v651_v62, %v687_v0 }
 0x14f   : > { %v728_v6 = vpack.c.bf16 %v703_v5, %v702_v63  ;;  %v856_v5 = vpop.permute.xlu1 %855 }
 0x150   : > { %v677_v7 = vmul.f32 0.01, %v626_v4  ;;  %vm661_vm5 = vcmp.gt.f32.partialorder %v626_v4, 0.0  ;;  %v866_v8 = vpop.permute.xlu2 %865 }
 0x151   : > { %v653_v9 = vpop.f32.mrf.mxu3  ;;  %832 = vmatmul.bf16.vlgmr.msra.gmra.mxu3 %v728_v6 }
 0x152   : > { %v693_v11 = vsel %vm661_vm5, %v626_v4, %v677_v7  ;;  %v654_v13 = vadd.f32 %v1465_v44, %v653_v9  ;;  %v846_v4 = vpop.permute.xlu0 %845 }
 0x153   : > { %v723_v12 = vpack.c.bf16 %v693_v11, %v692_v10 }
 0x154   : > { %v688_v16 = vmul.f32 0.01, %v654_v13  ;;  %vm672_vm6 = vcmp.gt.f32.partialorder %v654_v13, 0.0 }
 0x155   : > { %v628_v14 = vpop.f32.mrf.mxu1  ;;  %807 = vmatmul.bf16.gmra.mxu2 %v723_v12 }
 0x156   : > { %v629_v19 = vadd.f32 %v1465_v44, %v628_v14  ;;  %v704_v22 = vsel %vm672_vm6, %v654_v13, %v688_v16 }
 0x157   : > { %v861_v6 = vpop.permute.xlu1 %860 }
 0x158   : > { %v678_v27 = vmul.f32 0.01, %v629_v19  ;;  %vm662_vm8 = vcmp.gt.f32.partialorder %v629_v19, 0.0 }
 0x159   : > { %v655_v18 = vpop.f32.mrf.mxu3 }
 0x15a   : > { %v656_v20 = vadd.f32 %v1465_v44, %v655_v18  ;;  %v694_v33 = vsel %vm662_vm8, %v629_v19, %v678_v27  ;;  %v851_v7 = vpop.permute.xlu0 %850 }
 0x15c   : > { %v689_v21 = vmul.f32 0.01, %v656_v20  ;;  %vm673_vm7 = vcmp.gt.f32.partialorder %v656_v20, 0.0 }
 0x15d   : > { %v630_v23 = vpop.f32.mrf.mxu1 }
 0x15e   : > { %v631_v28 = vadd.f32 %v1465_v44, %v630_v23  ;;  %v705_v29 = vsel %vm673_vm7, %v656_v20, %v689_v21 }
 0x15f   : > { %v729_v30 = vpack.c.bf16 %v705_v29, %v704_v22  ;;  %v881_v10 = vpop.permute.xlu1 %880 }
 0x160   : > { %v679_v31 = vmul.f32 0.01, %v631_v28  ;;  %vm663_vm9 = vcmp.gt.f32.partialorder %v631_v28, 0.0 }
 0x161   : > { %837 = vmatmul.bf16.gmra.mxu3 %v729_v30 }
 0x162   : > { %v695_v34 = vsel %vm663_vm9, %v631_v28, %v679_v31  ;;  %v876_v9 = vpop.permute.xlu0 %875 }
 0x163   : > { %v724_v35 = vpack.c.bf16 %v695_v34, %v694_v33  ;;  %v871_v12 = vpop.permute.xlu2 %870 }
 0x165   : > { %v633_v36 = vpop.f32.mrf.mxu1  ;;  %812 = vmatmul.bf16.gmra.mxu2 %v724_v35 }
 0x166   : > { %v634_v39 = vadd.f32 %v1465_v44, %v633_v36 }
 0x168   : > { %v680_v41 = vmul.f32 0.01, %v634_v39  ;;  %vm664_vm10 = vcmp.gt.f32.partialorder %v634_v39, 0.0 }
 0x16a   : > { %v696_v45 = vsel %vm664_vm10, %v634_v39, %v680_v41  ;;  %v891_v13 = vpop.permute.xlu0 %890 }
 0x16b   : > { %v886_v19 = vpop.permute.xlu2 %885 }
 0x16d   : > { %v635_v25 = vpop.f32.mrf.mxu1 }
 0x16e   : > { %v636_v42 = vadd.f32 %v1465_v44, %v635_v25 }
 0x170   : > { %v681_v43 = vmul.f32 0.01, %v636_v42  ;;  %vm665_vm11 = vcmp.gt.f32.partialorder %v636_v42, 0.0 }
 0x172   : > { %v697_v46 = vsel %vm665_vm11, %v636_v42, %v681_v43  ;;  %v906_v21 = vpop.permute.xlu0 %905 }
 0x173   : > { %v725_v47 = vpack.c.bf16 %v697_v46, %v696_v45 }
 0x175   : > { %v638_v48 = vpop.f32.mrf.mxu1  ;;  %817 = vmatmul.bf16.gmra.mxu2 %v725_v47 }
 0x176   : > { %v639_v50 = vadd.f32 %v1465_v44, %v638_v48 }
 0x178   : > { %v682_v53 = vmul.f32 0.01, %v639_v50  ;;  %vm666_vm12 = vcmp.gt.f32.partialorder %v639_v50, 0.0 }
 0x17a   : > { %v698_v56 = vsel %vm666_vm12, %v639_v50, %v682_v53  ;;  %v921_v36 = vpop.permute.xlu0 %920 }
 0x17d   : > { %v640_v52 = vpop.f32.mrf.mxu1 }
 0x17e   : > { %v641_v54 = vadd.f32 %v1465_v44, %v640_v52 }
 0x180   : > { %v683_v55 = vmul.f32 0.01, %v641_v54  ;;  %vm667_vm13 = vcmp.gt.f32.partialorder %v641_v54, 0.0 }
 0x182   : > { %v699_v57 = vsel %vm667_vm13, %v641_v54, %v683_v55 }
 0x183   : > { %v726_v58 = vpack.c.bf16 %v699_v57, %v698_v56 }
 0x185   : > { %v643_v59 = vpop.f32.mrf.mxu1  ;;  %822 = vmatmul.bf16.gmra.mxu2 %v726_v58 }
 0x186   : > { %v644_v60 = vadd.f32 %v1465_v44, %v643_v59 }
 0x188   : > { %v684_v62 = vmul.f32 0.01, %v644_v60  ;;  %vm668_vm14 = vcmp.gt.f32.partialorder %v644_v60, 0.0 }
 0x18a   : > { %v700_v1 = vsel %vm668_vm14, %v644_v60, %v684_v62 }
 0x18d   : > { %v645_v61 = vpop.f32.mrf.mxu1 }
 0x18e   : > { %v646_v63 = vadd.f32 %v1465_v44, %v645_v61  ;;  %v896_v44 = vpop.permute.xlu1 %895 }
 0x190   : > { %v685_v0 = vmul.f32 0.01, %v646_v63  ;;  %vm669_vm15 = vcmp.gt.f32.partialorder %v646_v63, 0.0 }
 0x192   : > { %v701_v2 = vsel %vm669_vm15, %v646_v63, %v685_v0 }
 0x193   : > { %v727_v3 = vpack.c.bf16 %v701_v2, %v700_v1 }
 0x195   : > { %827 = vmatmul.bf16.gmra.mxu2 %v727_v3 }
 0x196   : > { %v911_v22 = vpop.permute.xlu1 %910 }
 0x19d   : > { %v901_v27 = vpop.permute.xlu2 %900 }
 0x1a5   : > { %v916_v35 = vpop.permute.xlu2 %915 }
 0x1c8   : > { %v803_v11 = vpop.f32.mrf.mxu2 }
 0x1c9   : > { %v923_v15 = vmul.f32 %v846_v4, %v803_v11 }
 0x1d0   : > { %v805_v14 = vpop.f32.mrf.mxu2 }
 0x1d1   : > { %v924_v16 = vmul.f32 %v851_v7, %v805_v14 }
 0x1d3   : > { %v1215_v17 = vpack.c.bf16 %v924_v16, %v923_v15 }
 0x1d4   : > { %v833_v18 = vpop.f32.mrf.mxu3 }
 0x1d5   : > { %1216 = vst [vmem:[%s1503_s27] sm:$0xff] %v1215_v17   ;;  %v935_v23 = vmul.f32 %v906_v21, %v833_v18 }
 0x1d8   : > { %v808_v20 = vpop.f32.mrf.mxu2 }
 0x1d9   : > { %v925_v30 = vmul.f32 %v856_v5, %v808_v20 }
 0x1dc   : > { %v835_v24 = vpop.f32.mrf.mxu3 }
 0x1dd   : > { %v936_v26 = vmul.f32 %v911_v22, %v835_v24 }
 0x1df   : > { %v1245_v28 = vpack.c.bf16 %v936_v26, %v935_v23 }
 0x1e0   : > { %v810_v29 = vpop.f32.mrf.mxu2 }
 0x1e1   : > { %v926_v31 = vmul.f32 %v861_v6, %v810_v29  ;;  %1257 = vst [vmem:[%s1503_s27 + $0x30] sm:$0xff] %v1245_v28  }
 0x1e3   : > { %v1220_v32 = vpack.c.bf16 %v926_v31, %v925_v30 }
 0x1e4   : > { %v838_v33 = vpop.f32.mrf.mxu3 }
 0x1e5   : > { %1252 = vst [vmem:[%s1503_s27 + $0x8] sm:$0xff] %v1220_v32   ;;  %v937_v37 = vmul.f32 %v916_v35, %v838_v33 }
 0x1e8   : > { %v813_v34 = vpop.f32.mrf.mxu2 }
 0x1e9   : > { %v927_v41 = vmul.f32 %v866_v8, %v813_v34 }
 0x1ec   : > { %v840_v38 = vpop.f32.mrf.mxu3 }
 0x1ed   : > { %v938_v39 = vmul.f32 %v921_v36, %v840_v38 }
 0x1ef   : > { %v1250_v25 = vpack.c.bf16 %v938_v39, %v937_v37 }
 0x1f0   : > { %v815_v40 = vpop.f32.mrf.mxu2 }
 0x1f1   : > { %v928_v42 = vmul.f32 %v871_v12, %v815_v40  ;;  %1258 = vst [vmem:[%s1503_s27 + $0x38] sm:$0xff] %v1250_v25  }
 0x1f3   : > { %v1225_v43 = vpack.c.bf16 %v928_v42, %v927_v41 }
 0x1f5   : > { %1253 = vst [vmem:[%s1503_s27 + $0x10] sm:$0xff] %v1225_v43  }
 0x1f8   : > { %v818_v45 = vpop.f32.mrf.mxu2 }
 0x1f9   : > { %v929_v47 = vmul.f32 %v876_v9, %v818_v45 }
 0x200   : > { %v820_v46 = vpop.f32.mrf.mxu2 }
 0x201   : > { %v930_v48 = vmul.f32 %v881_v10, %v820_v46 }
 0x203   : > { %v1230_v49 = vpack.c.bf16 %v930_v48, %v929_v47 }
 0x205   : > { %1254 = vst [vmem:[%s1503_s27 + $0x18] sm:$0xff] %v1230_v49  }
 0x208   : > { %v823_v50 = vpop.f32.mrf.mxu2 }
 0x209   : > { %v931_v52 = vmul.f32 %v886_v19, %v823_v50 }
 0x210   : > { %v825_v51 = vpop.f32.mrf.mxu2 }
 0x211   : > { %v932_v53 = vmul.f32 %v891_v13, %v825_v51 }
 0x213   : > { %v1235_v54 = vpack.c.bf16 %v932_v53, %v931_v52 }
 0x215   : > { %1255 = vst [vmem:[%s1503_s27 + $0x20] sm:$0xff] %v1235_v54  }
 0x218   : > { %v828_v55 = vpop.f32.mrf.mxu2 }
 0x219   : > { %v933_v57 = vmul.f32 %v896_v44, %v828_v55 }
 0x220   : > { %v830_v56 = vpop.f32.mrf.mxu2 }
 0x221   : > { %v934_v58 = vmul.f32 %v901_v27, %v830_v56 }
 0x223   : > { %v1240_v59 = vpack.c.bf16 %v934_v58, %v933_v57 }
 0x225   : > { %1256 = vst [vmem:[%s1503_s27 + $0x28] sm:$0xff] %v1240_v59  }
 0x226 PF: > { %s17_s24 = sadd.s32 1, %s1303_s24  }
 0x227   : > { %p14_p4 = scmp.ge.s32.totalorder %s17_s24, 5  }
 0x229   :  { %16 = sbr.rel (!%p14_p4) target bundleno = 1 (0x1), region = 81 }

// kernel: botgcn_single.4
= control target key start
LH: loop header
LB: loop body
LE: loop exit
PB: predicated region body
PF: predicated region fallthrough
CT: control target
= control target key end

     0   :  { %s1416_s18 = smov 0   ;;  %s1418_s19 = smov 0   ;;  %s1660_s0 = inlined_call_operand.vmem [shape: bf16[384,384], index: 0, kind: input, shape index: {}]   ;;  %s1661_s1 = inlined_call_operand.vmem [shape: bf16[384,128], index: 1, kind: input, shape index: {}]   ;;  %s1662_s2 = inlined_call_operand.vmem [shape: f32[384,1], index: 2, kind: input, shape index: {}]   ;;  %s1663_s3 = inlined_call_operand.vmem [shape: f32[1,128], index: 3, kind: input, shape index: {}]   ;;  %s1664_s4 = inlined_call_operand.vmem [shape: bf16[128,128], index: 4, kind: input, shape index: {}]   ;;  %s1665_s5 = inlined_call_operand.vmem [shape: bf16[384,128], index: 5, kind: output, shape index: {}]  }
   0x1   :  { %s1420_s20 = smov 0   ;;  %s1422_s21 = smov 0  }
   0x2   :  { %s1424_s22 = smov 0   ;;  %s1426_s23 = smov 0  }
   0x3   :  { %s1428_s24 = smov 0  }
   0x4 LB: > { %s24_s25 = sadd.s32 1, %s1374_s22  ;;  %s27_s26 = sadd.s32 1, %s1378_s23  ;;  %s1382_s24 = sphi %s1428_s24, %s15_s24   ;;  %s1378_s23 = sphi %s1426_s23, %s1671_s23   ;;  %s1374_s22 = sphi %s1424_s22, %s1670_s22   ;;  %s1370_s21 = sphi %s1422_s21, %s1669_s21   ;;  %s1366_s20 = sphi %s1420_s20, %s1668_s20   ;;  %s1362_s19 = sphi %s1418_s19, %s1667_s19   ;;  %s1358_s18 = sphi %s1416_s18, %s1666_s18  }
   0x5   : > { %p25_p0 = scmp.ge.s32.totalorder %s24_s25, 3  ;;  %p43_p1 = scmp.ne.s32.totalorder %s1362_s19, %s1358_s18 }
   0x6   : > { %p44_p2 = scmp.eq.s32.totalorder %s1382_s24, 0  ;;  %s36_s30 = sadd.s32 1, %s1362_s19 }
   0x7   : > { %s1673_s25 = smov (%p25_p0, %s24_s25), 0  ;;  %s1675_s26 = smov (!%p25_p0, %s27_s26), %s1378_s23 }
   0x8   : > { %p45_p3 = por %p44_p2, %p43_p1  ;;  %p29_p4 = scmp.ge.s32.totalorder %s1675_s26, 3 }
   0x9   : > { %s32_s27 = ssub.s32 %s1374_s22, %s1673_s25  ;;  %p1033_p6 = scmp.ge.s32.totalorder %s1382_s24, 9 }
   0xa   : > { %s1677_s26 = smov (%p29_p4, %s1675_s26), 0 }
   0xb   : > { %s31_s28 = ssub.s32 %s1378_s23, %s1677_s26  ;;  %193 = sbr.rel (%p1033_p6) target bundleno = 39 (0x27), region = 28 }
   0xc   : > { %s33_s29 = sor.u32 %s32_s27, %s31_s28 }
   0xd   : > { %p34_p5 = scmp.eq.s32.totalorder %s33_s29, 0 }
   0xf   : > { %s1467_s6 = scalar_select %p34_p5, %s1362_s19, %s36_s30  }
  0x10   : > { %196 = sbr.rel (!%p45_p3) target bundleno = 39 (0x27), region = 32  ;;  %s198_s7 = sand.u32 (%p45_p3), 1, %s1362_s19  }
  0x11   : > { %s1265_s8 = smul.u32 (%p45_p3), 48, %s1378_s23  ;;  %s1034_s9 = sshll.u32 (%p45_p3), %s198_s7, 6 }
  0x12   : > { %s200_s15 = scalar_lea.vmem (%p45_p3), [#allocation3], %s1034_s9 }
  0x13   : > { %s203_s10 = sadd.s32 (%p45_p3), %s1374_s22, %s1265_s8 }
  0x14   : > { %s1037_s11 = sshll.u32 (%p45_p3), %s203_s10, 2 }
  0x15   : > { %s1476_s14 = scalar_lea.vmem %s1660_s0, %s1037_s11 }
  0x16   : > { %v222_v0 = vld [vmem:[%s1476_s14] sm:$0xf]  ;;  %v224_v1 = vld [vmem:[%s1476_s14 + $0xc] sm:$0xf]  ;;  %v226_v2 = vld [vmem:[%s1476_s14 + $0x18] sm:$0xf] }
  0x17   : > { %223 = vst [vmem:[%s200_s15] sm:$0xf] %v222_v0  ;;  %v228_v3 = vld [vmem:[%s1476_s14 + $0x24] sm:$0xf]  ;;  %v230_v4 = vld [vmem:[%s1476_s14 + $0x30] sm:$0xf] }
  0x18   : > { %225 = vst [vmem:[%s200_s15 + $0x4] sm:$0xf] %v224_v1  ;;  %v232_v5 = vld [vmem:[%s1476_s14 + $0x3c] sm:$0xf]  ;;  %v234_v6 = vld [vmem:[%s1476_s14 + $0x48] sm:$0xf] }
  0x19   : > { %227 = vst [vmem:[%s200_s15 + $0x8] sm:$0xf] %v226_v2  ;;  %v236_v7 = vld [vmem:[%s1476_s14 + $0x54] sm:$0xf]  ;;  %v238_v8 = vld [vmem:[%s1476_s14 + $0x60] sm:$0xf] }
  0x1a   : > { %229 = vst [vmem:[%s200_s15 + $0xc] sm:$0xf] %v228_v3  ;;  %v240_v9 = vld [vmem:[%s1476_s14 + $0x6c] sm:$0xf]  ;;  %v242_v10 = vld [vmem:[%s1476_s14 + $0x78] sm:$0xf] }
  0x1b   : > { %231 = vst [vmem:[%s200_s15 + $0x10] sm:$0xf] %v230_v4  ;;  %v244_v11 = vld [vmem:[%s1476_s14 + $0x84] sm:$0xf]  ;;  %v246_v12 = vld [vmem:[%s1476_s14 + $0x90] sm:$0xf] }
  0x1c   : > { %233 = vst [vmem:[%s200_s15 + $0x14] sm:$0xf] %v232_v5  ;;  %v248_v13 = vld [vmem:[%s1476_s14 + $0x9c] sm:$0xf]  ;;  %v250_v14 = vld [vmem:[%s1476_s14 + $0xa8] sm:$0xf] }
  0x1d   : > { %235 = vst [vmem:[%s200_s15 + $0x18] sm:$0xf] %v234_v6  ;;  %v252_v15 = vld [vmem:[%s1476_s14 + $0xb4] sm:$0xf] }
  0x1e   : > { %237 = vst [vmem:[%s200_s15 + $0x1c] sm:$0xf] %v236_v7 }
  0x1f   : > { %239 = vst [vmem:[%s200_s15 + $0x20] sm:$0xf] %v238_v8 }
  0x20   : > { %241 = vst [vmem:[%s200_s15 + $0x24] sm:$0xf] %v240_v9 }
  0x21   : > { %243 = vst [vmem:[%s200_s15 + $0x28] sm:$0xf] %v242_v10 }
  0x22   : > { %245 = vst [vmem:[%s200_s15 + $0x2c] sm:$0xf] %v244_v11 }
  0x23   : > { %247 = vst [vmem:[%s200_s15 + $0x30] sm:$0xf] %v246_v12 }
  0x24   : > { %249 = vst [vmem:[%s200_s15 + $0x34] sm:$0xf] %v248_v13 }
  0x25   : > { %251 = vst [vmem:[%s200_s15 + $0x38] sm:$0xf] %v250_v14 }
  0x26   : > { %253 = vst [vmem:[%s200_s15 + $0x3c] sm:$0xf] %v252_v15 }
  0x27 PF: > { %p1038_p7 = scmp.ge.s32.totalorder %s1382_s24, 1  ;;  %p317_p8 = scmp.lt.s32.totalorder %s1382_s24, 10 }
  0x29   : > { %p318_p9 = pnand %p1038_p7, %p317_p8 }
  0x2a   : > { %s324_s16 = sand.u32 (!%p318_p9), 1, %s1358_s18   ;;  %s1040_s17 = sshll.u32 (!%p318_p9), %s1370_s21, 4 }
  0x2b   : > { %321 = sbr.rel (%p318_p9) target bundleno = 570 (0x23a), region = 77  ;;  %s1039_s27 = sshll.u32 (!%p318_p9), %s324_s16, 6 }
  0x2c   : > { %p358_p10 = scmp.lt.s32.totalorder (!%p318_p9), %s1040_s17, 47  ;;  %s1508_s12 = scalar_lea.vmem (!%p318_p9), [#allocation3], %s1039_s27 }
  0x2d   : > { %p1044_p11 = scmp.ne.s32.totalorder (!%p318_p9), %s1366_s20, 0 }
  0x30   : > { %s1679_s17 = smov (!%p358_p10, %s1040_s17), 47  ;;  %372 = sbr.rel (%p1044_p11) target bundleno = 70 (0x46), region = 85 }
  0x31   : > { %s1041_s28 = sshll.u32 %s1679_s17, 3  ;;  %s1043_s29 = sshll.u32 %s1679_s17, 2 }
  0x32   : > { %s1501_s8 = scalar_lea.vmem %s1662_s2, %s1041_s28  ;;  %s1506_s11 = scalar_lea.vmem %s1665_s5, %s1043_s29 }
  0x35   : > { %v1384_v16 = vmov 0.0  }
  0x36   : > { %373 = vst [vmem:[#allocation2 + $0x30] sm:$0xff] %v1384_v16 }
  0x37   : > { %374 = vst [vmem:[#allocation2] sm:$0xff] %v1384_v16 }
  0x38   : > { %375 = vst [vmem:[#allocation2 + $0x58] sm:$0xff] %v1384_v16 }
  0x39   : > { %376 = vst [vmem:[#allocation2 + $0x18] sm:$0xff] %v1384_v16 }
  0x3a   : > { %377 = vst [vmem:[#allocation2 + $0x50] sm:$0xff] %v1384_v16 }
  0x3b   : > { %378 = vst [vmem:[#allocation2 + $0x68] sm:$0xff] %v1384_v16 }
  0x3c   : > { %379 = vst [vmem:[#allocation2 + $0x8] sm:$0xff] %v1384_v16 }
  0x3d   : > { %380 = vst [vmem:[#allocation2 + $0x48] sm:$0xff] %v1384_v16 }
  0x3e   : > { %381 = vst [vmem:[#allocation2 + $0x40] sm:$0xff] %v1384_v16 }
  0x3f   : > { %382 = vst [vmem:[#allocation2 + $0x20] sm:$0xff] %v1384_v16 }
  0x40   : > { %383 = vst [vmem:[#allocation2 + $0x10] sm:$0xff] %v1384_v16 }
  0x41   : > { %384 = vst [vmem:[#allocation2 + $0x38] sm:$0xff] %v1384_v16 }
  0x42   : > { %385 = vst [vmem:[#allocation2 + $0x60] sm:$0xff] %v1384_v16 }
  0x43   : > { %386 = vst [vmem:[#allocation2 + $0x70] sm:$0xff] %v1384_v16 }
  0x44   : > { %387 = vst [vmem:[#allocation2 + $0x78] sm:$0xff] %v1384_v16 }
  0x45   : > { %388 = vst [vmem:[#allocation2 + $0x28] sm:$0xff] %v1384_v16 }
  0x46 PF: > { %s1045_s18 = sshll.u32 %s1366_s20, 7  ;;  %v1146_v25 = vld [vmem:[%s1508_s12] sm:$0xff]  ;;  %v1148_v26 = vld [vmem:[%s1508_s12 + $0x10] sm:$0xff]  ;;  %v1147_v29 = vld [vmem:[%s1508_s12 + $0x8] sm:$0xff]  ;;  %p1111_p12 = scmp.ne.s32.totalorder %s1366_s20, 2 }
  0x47   : > { %s422_s21 = sshra.s32 %s1045_s18, 3  ;;  %v1150_v27 = vld [vmem:[%s1508_s12 + $0x20] sm:$0xff]  ;;  %v1152_v28 = vld [vmem:[%s1508_s12 + $0x30] sm:$0xff]  ;;  %v1149_v30 = vld [vmem:[%s1508_s12 + $0x18] sm:$0xff] }
  0x48   : > { %s1046_s13 = sshll.u32 %s422_s21, 2  ;;  %v1151_v31 = vld [vmem:[%s1508_s12 + $0x28] sm:$0xff]  ;;  %v1153_v32 = vld [vmem:[%s1508_s12 + $0x38] sm:$0xff]  ;;  %v390_v33 = vld [vmem:[#allocation2 + $0x30] sm:$0xff] }
  0x49   : > { %s1515_s16 = scalar_lea.vmem %s1661_s1, %s1046_s13  ;;  %v394_v34 = vld [vmem:[#allocation2 + $0x50] sm:$0xff]  ;;  %v398_v39 = vld [vmem:[#allocation2 + $0x40] sm:$0xff]  ;;  %v395_v42 = vld [vmem:[#allocation2 + $0x68] sm:$0xff] }
  0x4a   : > { %v1161_v17 = vld [vmem:[%s1515_s16 + $0x38] sm:$0xff]  ;;  %v1160_v18 = vld [vmem:[%s1515_s16 + $0x30] sm:$0xff]  ;;  %v1159_v19 = vld [vmem:[%s1515_s16 + $0x28] sm:$0xff] }
  0x4b   : > { %538 = vmatpush.bf16.msra.mxu0 %v1161_v17  ;;  %1217 = vmatpush.bf16.msra.mxu1 %v1161_v17  ;;  %v1158_v20 = vld [vmem:[%s1515_s16 + $0x20] sm:$0xff]  ;;  %v1157_v21 = vld [vmem:[%s1515_s16 + $0x18] sm:$0xff]  ;;  %v1156_v22 = vld [vmem:[%s1515_s16 + $0x10] sm:$0xff] }
  0x4c   : > { %1218 = vmatpush.bf16.msra.mxu2 %v1161_v17  ;;  %1219 = vmatpush.bf16.msra.mxu3 %v1161_v17  ;;  %v1155_v23 = vld [vmem:[%s1515_s16 + $0x8] sm:$0xff]  ;;  %v1154_v24 = vld [vmem:[%s1515_s16] sm:$0xff]  ;;  %v403_v52 = vld [vmem:[#allocation2 + $0x70] sm:$0xff] }
  0x4d   : > { %v402_v40 = vld [vmem:[#allocation2 + $0x60] sm:$0xff]  ;;  %v392_v53 = vld [vmem:[#allocation2 + $0x58] sm:$0xff]  ;;  %v396_v54 = vld [vmem:[#allocation2 + $0x8] sm:$0xff] }
  0x4e   : > { %v391_v41 = vld [vmem:[#allocation2] sm:$0xff]  ;;  %v400_v63 = vld [vmem:[#allocation2 + $0x10] sm:$0xff]  ;;  %v404_v0 = vld [vmem:[#allocation2 + $0x78] sm:$0xff] }
  0x4f   : > { %539 = vmatpush.bf16.msra.mxu0 %v1160_v18  ;;  %1220 = vmatpush.bf16.msra.mxu1 %v1160_v18  ;;  %v399_v51 = vld [vmem:[#allocation2 + $0x20] sm:$0xff]  ;;  %v393_v1 = vld [vmem:[#allocation2 + $0x18] sm:$0xff]  ;;  %v397_v2 = vld [vmem:[#allocation2 + $0x48] sm:$0xff] }
  0x50   : > { %1221 = vmatpush.bf16.msra.mxu2 %v1160_v18  ;;  %1222 = vmatpush.bf16.msra.mxu3 %v1160_v18  ;;  %v401_v11 = vld [vmem:[#allocation2 + $0x38] sm:$0xff]  ;;  %v405_v12 = vld [vmem:[#allocation2 + $0x28] sm:$0xff] }
  0x53   : > { %540 = vmatpush.bf16.msra.mxu0 %v1159_v19  ;;  %1223 = vmatpush.bf16.msra.mxu1 %v1159_v19 }
  0x54   : > { %1224 = vmatpush.bf16.msra.mxu2 %v1159_v19  ;;  %1225 = vmatpush.bf16.msra.mxu3 %v1159_v19 }
  0x57   : > { %541 = vmatpush.bf16.msra.mxu0 %v1158_v20  ;;  %1226 = vmatpush.bf16.msra.mxu1 %v1158_v20 }
  0x58   : > { %1227 = vmatpush.bf16.msra.mxu2 %v1158_v20  ;;  %1228 = vmatpush.bf16.msra.mxu3 %v1158_v20 }
  0x5b   : > { %542 = vmatpush.bf16.msra.mxu0 %v1157_v21  ;;  %1229 = vmatpush.bf16.msra.mxu1 %v1157_v21 }
  0x5c   : > { %1230 = vmatpush.bf16.msra.mxu2 %v1157_v21  ;;  %1231 = vmatpush.bf16.msra.mxu3 %v1157_v21 }
  0x5f   : > { %543 = vmatpush.bf16.msra.mxu0 %v1156_v22  ;;  %1232 = vmatpush.bf16.msra.mxu1 %v1156_v22 }
  0x60   : > { %1233 = vmatpush.bf16.msra.mxu2 %v1156_v22  ;;  %1234 = vmatpush.bf16.msra.mxu3 %v1156_v22 }
  0x63   : > { %544 = vmatpush.bf16.msra.mxu0 %v1155_v23  ;;  %1235 = vmatpush.bf16.msra.mxu1 %v1155_v23 }
  0x64   : > { %1236 = vmatpush.bf16.msra.mxu2 %v1155_v23  ;;  %1237 = vmatpush.bf16.msra.mxu3 %v1155_v23 }
  0x67   : > { %545 = vmatpush.bf16.msra.mxu0 %v1154_v24  ;;  %1238 = vmatpush.bf16.msra.mxu1 %v1154_v24 }
  0x68   : > { %1239 = vmatpush.bf16.msra.mxu2 %v1154_v24  ;;  %1240 = vmatpush.bf16.msra.mxu3 %v1154_v24 }
  0x6a   : > { %546 = vmatmul.bf16.vlgmr.msra.gmra.mxu0 %v1146_v25  ;;  %556 = vmatmul.bf16.vlgmr.msra.gmra.mxu1 %v1148_v26 }
  0x6b   : > { %566 = vmatmul.bf16.vlgmr.msra.gmra.mxu2 %v1150_v27  ;;  %576 = vmatmul.bf16.vlgmr.msra.gmra.mxu3 %v1152_v28 }
  0x7a   : > { %551 = vmatmul.bf16.gmra.mxu0 %v1147_v29  ;;  %561 = vmatmul.bf16.gmra.mxu1 %v1149_v30 }
  0x7b   : > { %571 = vmatmul.bf16.gmra.mxu2 %v1151_v31  ;;  %581 = vmatmul.bf16.gmra.mxu3 %v1153_v32 }
  0xe7   : > { %v547_v35 = vpop.f32.mrf.mxu0  ;;  %v557_v36 = vpop.f32.mrf.mxu1 }
  0xe8   : > { %v587_v37 = vadd.f32 %v547_v35, %v390_v33  ;;  %v591_v38 = vadd.f32 %v557_v36, %v394_v34 }
  0xea   : > { %603 = vst [vmem:[#allocation2 + $0x30] sm:$0xff] %v587_v37 }
  0xeb   : > { %607 = vst [vmem:[#allocation2 + $0x50] sm:$0xff] %v591_v38 }
  0xee   : > { %v567_v43 = vpop.f32.mrf.mxu2  ;;  %v577_v44 = vpop.f32.mrf.mxu3 }
  0xef   : > { %v595_v45 = vadd.f32 %v567_v43, %v398_v39  ;;  %v599_v46 = vadd.f32 %v577_v44, %v402_v40  ;;  %v549_v47 = vpop.f32.mrf.mxu0  ;;  %v559_v48 = vpop.f32.mrf.mxu1 }
  0xf0   : > { %v588_v49 = vadd.f32 %v549_v47, %v391_v41  ;;  %v592_v50 = vadd.f32 %v559_v48, %v395_v42 }
  0xf1   : > { %611 = vst [vmem:[#allocation2 + $0x40] sm:$0xff] %v595_v45 }
  0xf2   : > { %615 = vst [vmem:[#allocation2 + $0x60] sm:$0xff] %v599_v46 }
  0xf3   : > { %604 = vst [vmem:[#allocation2] sm:$0xff] %v588_v49 }
  0xf4   : > { %608 = vst [vmem:[#allocation2 + $0x68] sm:$0xff] %v592_v50 }
  0xf6   : > { %v569_v55 = vpop.f32.mrf.mxu2  ;;  %v579_v56 = vpop.f32.mrf.mxu3 }
  0xf7   : > { %v596_v57 = vadd.f32 %v569_v55, %v399_v51  ;;  %v600_v58 = vadd.f32 %v579_v56, %v403_v52  ;;  %v552_v59 = vpop.f32.mrf.mxu0  ;;  %v562_v60 = vpop.f32.mrf.mxu1 }
  0xf8   : > { %v589_v61 = vadd.f32 %v552_v59, %v392_v53  ;;  %v593_v62 = vadd.f32 %v562_v60, %v396_v54 }
  0xf9   : > { %612 = vst [vmem:[#allocation2 + $0x20] sm:$0xff] %v596_v57 }
  0xfa   : > { %616 = vst [vmem:[#allocation2 + $0x70] sm:$0xff] %v600_v58 }
  0xfb   : > { %605 = vst [vmem:[#allocation2 + $0x58] sm:$0xff] %v589_v61 }
  0xfc   : > { %609 = vst [vmem:[#allocation2 + $0x8] sm:$0xff] %v593_v62 }
  0xfe   : > { %v572_v3 = vpop.f32.mrf.mxu2  ;;  %v582_v4 = vpop.f32.mrf.mxu3 }
  0xff   : > { %v597_v5 = vadd.f32 %v572_v3, %v400_v63  ;;  %v601_v6 = vadd.f32 %v582_v4, %v404_v0  ;;  %v554_v7 = vpop.f32.mrf.mxu0  ;;  %v564_v8 = vpop.f32.mrf.mxu1 }
 0x100   : > { %v590_v9 = vadd.f32 %v554_v7, %v393_v1  ;;  %v594_v10 = vadd.f32 %v564_v8, %v397_v2 }
 0x101   : > { %613 = vst [vmem:[#allocation2 + $0x10] sm:$0xff] %v597_v5 }
 0x102   : > { %617 = vst [vmem:[#allocation2 + $0x78] sm:$0xff] %v601_v6 }
 0x103   : > { %606 = vst [vmem:[#allocation2 + $0x18] sm:$0xff] %v590_v9 }
 0x104   : > { %610 = vst [vmem:[#allocation2 + $0x48] sm:$0xff] %v594_v10 }
 0x106   : > { %v574_v13 = vpop.f32.mrf.mxu2  ;;  %v584_v14 = vpop.f32.mrf.mxu3  ;;  %622 = sbr.rel (%p1111_p12) target bundleno = 570 (0x23a), region = 89 }
 0x107   : > { %v598_v15 = vadd.f32 %v574_v13, %v401_v11  ;;  %v602_v16 = vadd.f32 %v584_v14, %v405_v12 }
 0x109   : > { %614 = vst [vmem:[#allocation2 + $0x38] sm:$0xff] %v598_v15 }
 0x10a   : > { %618 = vst [vmem:[#allocation2 + $0x28] sm:$0xff] %v602_v16 }
 0x10b   : > { %v635_v17 = vld [vmem:[%s1501_s8 + $0x60] sm:$0xff]  ;;  %v1385_v20 = vmov 0   ;;  %v636_v21 = vld [vmem:[%s1501_s8 + $0x68] sm:$0xff]  ;;  %v1169_v24 = vld [vmem:[%s1664_s4 + $0x38] sm:$0xff] }
 0x10c   : > { %v631_v18 = vld [vmem:[%s1501_s8 + $0x40] sm:$0xff]  ;;  %1326 = vset.pattern.permute.xlu2 %v1385_v20  ;;  %1325 = vset.pattern.permute.xlu1 %v1385_v20  ;;  %v632_v22 = vld [vmem:[%s1501_s8 + $0x48] sm:$0xff]  ;;  %v1168_v25 = vld [vmem:[%s1664_s4 + $0x30] sm:$0xff] }
 0x10d   : > { %v623_v19 = vld [vmem:[%s1501_s8] sm:$0xff]  ;;  %1324 = vset.pattern.permute.xlu0 %v1385_v20  ;;  %717 = vperm.xlu1 %1325, %v635_v17   ;;  %v624_v23 = vld [vmem:[%s1501_s8 + $0x8] sm:$0xff]  ;;  %v633_v28 = vld [vmem:[%s1501_s8 + $0x50] sm:$0xff] }
 0x10e   : > { %697 = vperm.xlu0 %1324, %v631_v18   ;;  %657 = vperm.xlu2 %1326, %v623_v19   ;;  %v628_v26 = vld [vmem:[%s1501_s8 + $0x28] sm:$0xff]  ;;  %v627_v27 = vld [vmem:[%s1501_s8 + $0x20] sm:$0xff]  ;;  %v637_v31 = vld [vmem:[%s1501_s8 + $0x70] sm:$0xff] }
 0x10f   : > { %843 = vmatpush.bf16.msra.mxu0 %v1169_v24  ;;  %1242 = vmatpush.bf16.msra.mxu2 %v1169_v24  ;;  %v1167_v29 = vld [vmem:[%s1664_s4 + $0x28] sm:$0xff]  ;;  %v1166_v30 = vld [vmem:[%s1664_s4 + $0x20] sm:$0xff]  ;;  %v634_v32 = vld [vmem:[%s1501_s8 + $0x58] sm:$0xff] }
 0x110   : > { %1243 = vmatpush.bf16.msra.mxu3 %v1169_v24  ;;  %1241 = vmatpush.bf16.msra.mxu1 %v1169_v24  ;;  %v638_v33 = vld [vmem:[%s1501_s8 + $0x78] sm:$0xff]  ;;  %v625_v36 = vld [vmem:[%s1501_s8 + $0x10] sm:$0xff]  ;;  %v1163_v40 = vld [vmem:[%s1664_s4 + $0x8] sm:$0xff] }
 0x111   : > { %v1165_v34 = vld [vmem:[%s1664_s4 + $0x18] sm:$0xff]  ;;  %v629_v37 = vld [vmem:[%s1501_s8 + $0x30] sm:$0xff]  ;;  %v1162_v41 = vld [vmem:[%s1664_s4] sm:$0xff] }
 0x112   : > { %v626_v35 = vld [vmem:[%s1501_s8 + $0x18] sm:$0xff]  ;;  %v1164_v39 = vld [vmem:[%s1664_s4 + $0x10] sm:$0xff]  ;;  %v1580_v45 = vld [vmem:[%s1663_s3] ss:$0 sm:$0xff] }
 0x113   : > { %844 = vmatpush.bf16.msra.mxu0 %v1168_v25  ;;  %1245 = vmatpush.bf16.msra.mxu2 %v1168_v25  ;;  %v630_v38 = vld [vmem:[%s1501_s8 + $0x38] sm:$0xff]  ;;  %v639_v43 = vld [vmem:[#allocation2 + $0x30] sm:$0xff]  ;;  %v640_v46 = vld [vmem:[#allocation2] sm:$0xff] }
 0x114   : > { %1246 = vmatpush.bf16.msra.mxu3 %v1168_v25  ;;  %1244 = vmatpush.bf16.msra.mxu1 %v1168_v25  ;;  %v651_v54 = vld [vmem:[#allocation2 + $0x60] sm:$0xff]  ;;  %v652_v57 = vld [vmem:[#allocation2 + $0x70] sm:$0xff]  ;;  %v644_v7 = vld [vmem:[#allocation2 + $0x68] sm:$0xff] }
 0x115   : > { %722 = vperm.xlu1 %1325, %v636_v21   ;;  %v647_v56 = vld [vmem:[#allocation2 + $0x40] sm:$0xff]  ;;  %v643_v8 = vld [vmem:[#allocation2 + $0x50] sm:$0xff]  ;;  %v654_v14 = vld [vmem:[#allocation2 + $0x28] sm:$0xff] }
 0x116   : > { %702 = vperm.xlu0 %1324, %v632_v22   ;;  %662 = vperm.xlu2 %1326, %v624_v23   ;;  %v648_v58 = vld [vmem:[#allocation2 + $0x20] sm:$0xff]  ;;  %v649_v16 = vld [vmem:[#allocation2 + $0x10] sm:$0xff]  ;;  %v653_v19 = vld [vmem:[#allocation2 + $0x78] sm:$0xff] }
 0x117   : > { %845 = vmatpush.bf16.msra.mxu0 %v1167_v29  ;;  %1248 = vmatpush.bf16.msra.mxu2 %v1167_v29  ;;  %v650_v21 = vld [vmem:[#allocation2 + $0x38] sm:$0xff] }
 0x118   : > { %1249 = vmatpush.bf16.msra.mxu3 %v1167_v29  ;;  %1247 = vmatpush.bf16.msra.mxu1 %v1167_v29 }
 0x11b   : > { %846 = vmatpush.bf16.msra.mxu0 %v1166_v30  ;;  %1251 = vmatpush.bf16.msra.mxu2 %v1166_v30 }
 0x11c   : > { %1252 = vmatpush.bf16.msra.mxu3 %v1166_v30  ;;  %1250 = vmatpush.bf16.msra.mxu1 %v1166_v30 }
 0x11d   : > { %682 = vperm.xlu1 %1325, %v628_v26  }
 0x11e   : > { %677 = vperm.xlu0 %1324, %v627_v27   ;;  %707 = vperm.xlu2 %1326, %v633_v28  }
 0x11f   : > { %847 = vmatpush.bf16.msra.mxu0 %v1165_v34  ;;  %1254 = vmatpush.bf16.msra.mxu2 %v1165_v34 }
 0x120   : > { %1255 = vmatpush.bf16.msra.mxu3 %v1165_v34  ;;  %1253 = vmatpush.bf16.msra.mxu1 %v1165_v34  ;;  %v641_v34 = vld [vmem:[#allocation2 + $0x58] sm:$0xff] }
 0x123   : > { %848 = vmatpush.bf16.msra.mxu0 %v1164_v39  ;;  %1257 = vmatpush.bf16.msra.mxu2 %v1164_v39 }
 0x124   : > { %1258 = vmatpush.bf16.msra.mxu3 %v1164_v39  ;;  %1256 = vmatpush.bf16.msra.mxu1 %v1164_v39 }
 0x125   : > { %727 = vperm.xlu1 %1325, %v637_v31  }
 0x126   : > { %712 = vperm.xlu0 %1324, %v634_v32   ;;  %732 = vperm.xlu2 %1326, %v638_v33   ;;  %v642_v33 = vld [vmem:[#allocation2 + $0x18] sm:$0xff] }
 0x127   : > { %849 = vmatpush.bf16.msra.mxu0 %v1163_v40  ;;  %1260 = vmatpush.bf16.msra.mxu2 %v1163_v40 }
 0x128   : > { %1261 = vmatpush.bf16.msra.mxu3 %v1163_v40  ;;  %1259 = vmatpush.bf16.msra.mxu1 %v1163_v40 }
 0x12b   : > { %850 = vmatpush.bf16.msra.mxu0 %v1162_v41  ;;  %1263 = vmatpush.bf16.msra.mxu2 %v1162_v41 }
 0x12c   : > { %1264 = vmatpush.bf16.msra.mxu3 %v1162_v41  ;;  %1262 = vmatpush.bf16.msra.mxu1 %v1162_v41  ;;  %v645_v41 = vld [vmem:[#allocation2 + $0x8] sm:$0xff] }
 0x12d   : > { %672 = vperm.xlu1 %1325, %v626_v35  }
 0x12e   : > { %667 = vperm.xlu0 %1324, %v625_v36   ;;  %687 = vperm.xlu2 %1326, %v629_v37  }
 0x136   : > { %692 = vperm.xlu0 %1324, %v630_v38  }
 0x168   : > { %v1574_v42 = vpop.permute.xlu2 %657 }
 0x169   : > { %v735_v44 = vmul.f32 %v1574_v42, %v639_v43 }
 0x16b   : > { %v755_v49 = vadd.f32 %v1580_v45, %v735_v44 }
 0x170   : > { %v1582_v47 = vpop.permute.xlu2 %662 }
 0x171   : > { %v736_v48 = vmul.f32 %v1582_v47, %v640_v46  ;;  %v646_v46 = vld [vmem:[#allocation2 + $0x48] sm:$0xff] }
 0x173   : > { %v756_v50 = vadd.f32 %v1580_v45, %v736_v48 }
 0x175   : > { %v771_v51 = vpack.c.bf16 %v756_v50, %v755_v49 }
 0x177   : > { %851 = vmatmul.bf16.vlgmr.msra.gmra.mxu0 %v771_v51 }
 0x178   : > { %v1601_v2 = vpop.permute.xlu2 %707 }
 0x179   : > { %v745_v22 = vmul.f32 %v1601_v2, %v649_v16 }
 0x17b   : > { %v765_v29 = vadd.f32 %v1580_v45, %v745_v22 }
 0x17f   : > { %v1587_v52 = vpop.permute.xlu1 %717 }
 0x180   : > { %v1589_v53 = vpop.permute.xlu0 %697  ;;  %v747_v55 = vmul.f32 %v1587_v52, %v651_v54  ;;  %v1610_v17 = vpop.permute.xlu2 %732 }
 0x181   : > { %v743_v59 = vmul.f32 %v1589_v53, %v647_v56  ;;  %v750_v20 = vmul.f32 %v1610_v17, %v654_v14 }
 0x182   : > { %v767_v63 = vadd.f32 %v1580_v45, %v747_v55 }
 0x183   : > { %v763_v3 = vadd.f32 %v1580_v45, %v743_v59  ;;  %v770_v28 = vadd.f32 %v1580_v45, %v750_v20 }
 0x187   : > { %v1593_v60 = vpop.permute.xlu1 %722 }
 0x188   : > { %v748_v61 = vmul.f32 %v1593_v60, %v652_v57  ;;  %v1596_v62 = vpop.permute.xlu0 %702  ;;  %v688_v43 = vpop.permute.xlu2 %687 }
 0x189   : > { %v744_v0 = vmul.f32 %v1596_v62, %v648_v58  ;;  %v741_v48 = vmul.f32 %v688_v43, %v645_v41 }
 0x18a   : > { %v768_v1 = vadd.f32 %v1580_v45, %v748_v61 }
 0x18b   : > { %v764_v4 = vadd.f32 %v1580_v45, %v744_v0  ;;  %v761_v51 = vadd.f32 %v1580_v45, %v741_v48 }
 0x18c   : > { %v777_v5 = vpack.c.bf16 %v768_v1, %v767_v63 }
 0x18d   : > { %v775_v6 = vpack.c.bf16 %v764_v4, %v763_v3 }
 0x18e   : > { %881 = vmatmul.bf16.vlgmr.msra.gmra.mxu3 %v777_v5 }
 0x18f   : > { %871 = vmatmul.bf16.vlgmr.msra.gmra.mxu2 %v775_v6  ;;  %v1605_v9 = vpop.permute.xlu1 %682 }
 0x190   : > { %v740_v10 = vmul.f32 %v1605_v9, %v644_v7  ;;  %v678_v11 = vpop.permute.xlu0 %677 }
 0x191   : > { %v739_v12 = vmul.f32 %v678_v11, %v643_v8 }
 0x192   : > { %v760_v13 = vadd.f32 %v1580_v45, %v740_v10 }
 0x193   : > { %v759_v15 = vadd.f32 %v1580_v45, %v739_v12 }
 0x195   : > { %v773_v18 = vpack.c.bf16 %v760_v13, %v759_v15 }
 0x197   : > { %861 = vmatmul.bf16.vlgmr.msra.gmra.mxu1 %v773_v18  ;;  %v728_v23 = vpop.permute.xlu1 %727 }
 0x198   : > { %v749_v24 = vmul.f32 %v728_v23, %v653_v19  ;;  %v713_v25 = vpop.permute.xlu0 %712 }
 0x199   : > { %v746_v26 = vmul.f32 %v713_v25, %v650_v21 }
 0x19a   : > { %v769_v27 = vadd.f32 %v1580_v45, %v749_v24 }
 0x19b   : > { %v766_v30 = vadd.f32 %v1580_v45, %v746_v26 }
 0x19c   : > { %v778_v31 = vpack.c.bf16 %v770_v28, %v769_v27 }
 0x19d   : > { %v776_v32 = vpack.c.bf16 %v766_v30, %v765_v29 }
 0x19e   : > { %886 = vmatmul.bf16.gmra.mxu3 %v778_v31 }
 0x19f   : > { %876 = vmatmul.bf16.gmra.mxu2 %v776_v32  ;;  %v673_v35 = vpop.permute.xlu1 %672 }
 0x1a0   : > { %v738_v36 = vmul.f32 %v673_v35, %v642_v33  ;;  %v668_v37 = vpop.permute.xlu0 %667 }
 0x1a1   : > { %v737_v38 = vmul.f32 %v668_v37, %v641_v34 }
 0x1a2   : > { %v758_v39 = vadd.f32 %v1580_v45, %v738_v36 }
 0x1a3   : > { %v757_v40 = vadd.f32 %v1580_v45, %v737_v38 }
 0x1a5   : > { %v772_v44 = vpack.c.bf16 %v758_v39, %v757_v40 }
 0x1a7   : > { %856 = vmatmul.bf16.gmra.mxu0 %v772_v44 }
 0x1a8   : > { %v693_v49 = vpop.permute.xlu0 %692 }
 0x1a9   : > { %v742_v50 = vmul.f32 %v693_v49, %v646_v46 }
 0x1ab   : > { %v762_v54 = vadd.f32 %v1580_v45, %v742_v50 }
 0x1ad   : > { %v774_v55 = vpack.c.bf16 %v762_v54, %v761_v51 }
 0x1af   : > { %866 = vmatmul.bf16.gmra.mxu1 %v774_v55 }
 0x1f4   : > { %v852_v56 = vpop.f32.mrf.mxu0 }
 0x1f5   : > { %v892_v58 = vmul.f32 %v852_v56, %v1574_v42 }
 0x1fc   : > { %v854_v57 = vpop.f32.mrf.mxu0 }
 0x1fd   : > { %v893_v59 = vmul.f32 %v854_v57, %v1582_v47 }
 0x1ff   : > { %v1173_v61 = vpack.c.bf16 %v893_v59, %v892_v58 }
 0x201   : > { %1174 = vst [vmem:[%s1506_s11] sm:$0xff] %v1173_v61  }
 0x211   : > { %v882_v63 = vpop.f32.mrf.mxu3 }
 0x212   : > { %v872_v0 = vpop.f32.mrf.mxu2  ;;  %v904_v4 = vmul.f32 %v882_v63, %v1587_v52 }
 0x213   : > { %v900_v6 = vmul.f32 %v872_v0, %v1589_v53 }
 0x214   : > { %v862_v1 = vpop.f32.mrf.mxu1 }
 0x215   : > { %v896_v8 = vmul.f32 %v862_v1, %v678_v11 }
 0x219   : > { %v884_v3 = vpop.f32.mrf.mxu3 }
 0x21a   : > { %v874_v45 = vpop.f32.mrf.mxu2  ;;  %v905_v5 = vmul.f32 %v884_v3, %v1593_v60 }
 0x21b   : > { %v901_v42 = vmul.f32 %v874_v45, %v1596_v62 }
 0x21c   : > { %v1203_v7 = vpack.c.bf16 %v905_v5, %v904_v4  ;;  %v864_v47 = vpop.f32.mrf.mxu1 }
 0x21d   : > { %v1193_v10 = vpack.c.bf16 %v901_v42, %v900_v6  ;;  %v897_v12 = vmul.f32 %v864_v47, %v1605_v9 }
 0x21e   : > { %1215 = vst [vmem:[%s1506_s11 + $0x30] sm:$0xff] %v1203_v7  }
 0x21f   : > { %1213 = vst [vmem:[%s1506_s11 + $0x20] sm:$0xff] %v1193_v10   ;;  %v1183_v13 = vpack.c.bf16 %v897_v12, %v896_v8 }
 0x221   : > { %1211 = vst [vmem:[%s1506_s11 + $0x10] sm:$0xff] %v1183_v13   ;;  %v887_v14 = vpop.f32.mrf.mxu3 }
 0x222   : > { %v877_v52 = vpop.f32.mrf.mxu2  ;;  %v906_v53 = vmul.f32 %v887_v14, %v728_v23 }
 0x223   : > { %v902_v11 = vmul.f32 %v877_v52, %v1601_v2 }
 0x224   : > { %v857_v15 = vpop.f32.mrf.mxu0 }
 0x225   : > { %v894_v21 = vmul.f32 %v857_v15, %v668_v37 }
 0x229   : > { %v889_v60 = vpop.f32.mrf.mxu3 }
 0x22a   : > { %v879_v16 = vpop.f32.mrf.mxu2  ;;  %v907_v62 = vmul.f32 %v889_v60, %v1610_v17 }
 0x22b   : > { %v903_v18 = vmul.f32 %v879_v16, %v713_v25 }
 0x22c   : > { %v1208_v9 = vpack.c.bf16 %v907_v62, %v906_v53  ;;  %v859_v19 = vpop.f32.mrf.mxu0  ;;  %v867_v20 = vpop.f32.mrf.mxu1 }
 0x22d   : > { %v1198_v22 = vpack.c.bf16 %v903_v18, %v902_v11  ;;  %v895_v24 = vmul.f32 %v859_v19, %v673_v35  ;;  %v898_v28 = vmul.f32 %v867_v20, %v688_v43 }
 0x22e   : > { %1216 = vst [vmem:[%s1506_s11 + $0x38] sm:$0xff] %v1208_v9  }
 0x22f   : > { %1214 = vst [vmem:[%s1506_s11 + $0x28] sm:$0xff] %v1198_v22   ;;  %v1178_v26 = vpack.c.bf16 %v895_v24, %v894_v21 }
 0x231   : > { %1210 = vst [vmem:[%s1506_s11 + $0x8] sm:$0xff] %v1178_v26  }
 0x234   : > { %v869_v27 = vpop.f32.mrf.mxu1 }
 0x235   : > { %v899_v23 = vmul.f32 %v869_v27, %v693_v49 }
 0x237   : > { %v1188_v29 = vpack.c.bf16 %v899_v23, %v898_v28 }
 0x239   : > { %1212 = vst [vmem:[%s1506_s11 + $0x18] sm:$0xff] %v1188_v29  }
 0x23a PF: > { %s15_s24 = sadd.s32 1, %s1382_s24   ;;  %s1666_s18 = smov %s1362_s19 }
 0x23b   : > { %p12_p13 = scmp.ge.s32.totalorder %s15_s24, 11   ;;  %s1667_s19 = smov %s1467_s6 }
 0x23c   : > { %s1668_s20 = smov %s1374_s22  ;;  %s1669_s21 = smov %s1378_s23 }
 0x23d   : > { %s1670_s22 = smov %s1673_s25  ;;  %s1671_s23 = smov %s1677_s26 }
 0x23e   :  { %14 = sbr.rel (!%p12_p13) target bundleno = 4 (0x4), region = 128 }

// kernel: botgcn_single.5
= control target key start
LH: loop header
LB: loop body
LE: loop exit
PB: predicated region body
PF: predicated region fallthrough
CT: control target
= control target key end

     0   :  { %s1644_s27 = smov 0   ;;  %s1646_s28 = smov 0   ;;  %s1908_s0 = inlined_call_operand.vmem [shape: bf16[384,384], index: 0, kind: input, shape index: {}]   ;;  %s1909_s1 = inlined_call_operand.vmem [shape: bf16[384,128], index: 1, kind: input, shape index: {}]   ;;  %s1910_s2 = inlined_call_operand.vmem [shape: f32[384,1], index: 2, kind: input, shape index: {}]   ;;  %s1911_s3 = inlined_call_operand.vmem [shape: f32[1,128], index: 3, kind: input, shape index: {}]   ;;  %s1912_s4 = inlined_call_operand.vmem [shape: bf16[128,128], index: 4, kind: input, shape index: {}]   ;;  %s1913_s5 = inlined_call_operand.vmem [shape: f32[1,128], index: 5, kind: input, shape index: {}]   ;;  %s1914_s6 = inlined_call_operand.vmem [shape: bf16[128,128], index: 6, kind: input, shape index: {}]   ;;  %s1915_s7 = inlined_call_operand.vmem [shape: f32[1,128], index: 7, kind: input, shape index: {}]   ;;  %s1916_s8 = inlined_call_operand.vmem [shape: f32[384,128], index: 8, kind: output, shape index: {}]  }
   0x1   :  { %s1648_s29 = smov 0   ;;  %s1650_s30 = smov 0  }
   0x2   :  { %s1652_s9 = smov 0   ;;  %s1654_s10 = smov 0  }
   0x3   :  { %s1656_s11 = smov 0  }
   0x4 LB: > { %s27_s12 = sadd.s32 1, %s1587_s9  ;;  %s30_s13 = sadd.s32 1, %s1591_s10  ;;  %s1595_s11 = sphi %s1656_s11, %s18_s11   ;;  %s1591_s10 = sphi %s1654_s10, %s1922_s10   ;;  %s1587_s9 = sphi %s1652_s9, %s1921_s9   ;;  %s1583_s30 = sphi %s1650_s30, %s1920_s30   ;;  %s1579_s29 = sphi %s1648_s29, %s1919_s29   ;;  %s1575_s28 = sphi %s1646_s28, %s1918_s28   ;;  %s1571_s27 = sphi %s1644_s27, %s1917_s27  }
   0x5   : > { %p28_p0 = scmp.ge.s32.totalorder %s27_s12, 3  ;;  %p46_p1 = scmp.ne.s32.totalorder %s1575_s28, %s1571_s27 }
   0x6   : > { %p47_p2 = scmp.eq.s32.totalorder %s1595_s11, 0  ;;  %s39_s17 = sadd.s32 1, %s1575_s28 }
   0x7   : > { %s1924_s12 = smov (%p28_p0, %s27_s12), 0  ;;  %s1926_s13 = smov (!%p28_p0, %s30_s13), %s1591_s10 }
   0x8   : > { %p48_p3 = por %p47_p2, %p46_p1  ;;  %p32_p4 = scmp.ge.s32.totalorder %s1926_s13, 3 }
   0x9   : > { %s35_s14 = ssub.s32 %s1587_s9, %s1924_s12  ;;  %p1259_p6 = scmp.ge.s32.totalorder %s1595_s11, 9 }
   0xa   : > { %s1928_s13 = smov (%p32_p4, %s1926_s13), 0 }
   0xb   : > { %s34_s15 = ssub.s32 %s1591_s10, %s1928_s13  ;;  %268 = sbr.rel (%p1259_p6) target bundleno = 39 (0x27), region = 40 }
   0xc   : > { %s36_s16 = sor.u32 %s35_s14, %s34_s15 }
   0xd   : > { %p37_p5 = scmp.eq.s32.totalorder %s36_s16, 0 }
   0xf   : > { %s1695_s18 = scalar_select %p37_p5, %s1575_s28, %s39_s17  }
  0x10   : > { %271 = sbr.rel (!%p48_p3) target bundleno = 39 (0x27), region = 44  ;;  %s273_s19 = sand.u32 (%p48_p3), 1, %s1575_s28  }
  0x11   : > { %s1476_s20 = smul.u32 (%p48_p3), 48, %s1591_s10  ;;  %s1260_s21 = sshll.u32 (%p48_p3), %s273_s19, 6 }
  0x12   : > { %s275_s14 = scalar_lea.vmem (%p48_p3), [#allocation3], %s1260_s21 }
  0x13   : > { %s278_s22 = sadd.s32 (%p48_p3), %s1587_s9, %s1476_s20 }
  0x14   : > { %s1263_s23 = sshll.u32 (%p48_p3), %s278_s22, 2 }
  0x15   : > { %s1704_s26 = scalar_lea.vmem %s1908_s0, %s1263_s23 }
  0x16   : > { %v297_v0 = vld [vmem:[%s1704_s26] sm:$0xf]  ;;  %v299_v1 = vld [vmem:[%s1704_s26 + $0xc] sm:$0xf]  ;;  %v301_v2 = vld [vmem:[%s1704_s26 + $0x18] sm:$0xf] }
  0x17   : > { %298 = vst [vmem:[%s275_s14] sm:$0xf] %v297_v0  ;;  %v303_v3 = vld [vmem:[%s1704_s26 + $0x24] sm:$0xf]  ;;  %v305_v4 = vld [vmem:[%s1704_s26 + $0x30] sm:$0xf] }
  0x18   : > { %300 = vst [vmem:[%s275_s14 + $0x4] sm:$0xf] %v299_v1  ;;  %v307_v5 = vld [vmem:[%s1704_s26 + $0x3c] sm:$0xf]  ;;  %v309_v6 = vld [vmem:[%s1704_s26 + $0x48] sm:$0xf] }
  0x19   : > { %302 = vst [vmem:[%s275_s14 + $0x8] sm:$0xf] %v301_v2  ;;  %v311_v7 = vld [vmem:[%s1704_s26 + $0x54] sm:$0xf]  ;;  %v313_v8 = vld [vmem:[%s1704_s26 + $0x60] sm:$0xf] }
  0x1a   : > { %304 = vst [vmem:[%s275_s14 + $0xc] sm:$0xf] %v303_v3  ;;  %v315_v9 = vld [vmem:[%s1704_s26 + $0x6c] sm:$0xf]  ;;  %v317_v10 = vld [vmem:[%s1704_s26 + $0x78] sm:$0xf] }
  0x1b   : > { %306 = vst [vmem:[%s275_s14 + $0x10] sm:$0xf] %v305_v4  ;;  %v319_v11 = vld [vmem:[%s1704_s26 + $0x84] sm:$0xf]  ;;  %v321_v12 = vld [vmem:[%s1704_s26 + $0x90] sm:$0xf] }
  0x1c   : > { %308 = vst [vmem:[%s275_s14 + $0x14] sm:$0xf] %v307_v5  ;;  %v323_v13 = vld [vmem:[%s1704_s26 + $0x9c] sm:$0xf]  ;;  %v325_v14 = vld [vmem:[%s1704_s26 + $0xa8] sm:$0xf] }
  0x1d   : > { %310 = vst [vmem:[%s275_s14 + $0x18] sm:$0xf] %v309_v6  ;;  %v327_v15 = vld [vmem:[%s1704_s26 + $0xb4] sm:$0xf] }
  0x1e   : > { %312 = vst [vmem:[%s275_s14 + $0x1c] sm:$0xf] %v311_v7 }
  0x1f   : > { %314 = vst [vmem:[%s275_s14 + $0x20] sm:$0xf] %v313_v8 }
  0x20   : > { %316 = vst [vmem:[%s275_s14 + $0x24] sm:$0xf] %v315_v9 }
  0x21   : > { %318 = vst [vmem:[%s275_s14 + $0x28] sm:$0xf] %v317_v10 }
  0x22   : > { %320 = vst [vmem:[%s275_s14 + $0x2c] sm:$0xf] %v319_v11 }
  0x23   : > { %322 = vst [vmem:[%s275_s14 + $0x30] sm:$0xf] %v321_v12 }
  0x24   : > { %324 = vst [vmem:[%s275_s14 + $0x34] sm:$0xf] %v323_v13 }
  0x25   : > { %326 = vst [vmem:[%s275_s14 + $0x38] sm:$0xf] %v325_v14 }
  0x26   : > { %328 = vst [vmem:[%s275_s14 + $0x3c] sm:$0xf] %v327_v15 }
  0x27 PF: > { %p1264_p7 = scmp.ge.s32.totalorder %s1595_s11, 1  ;;  %p392_p8 = scmp.lt.s32.totalorder %s1595_s11, 10 }
  0x29   : > { %p393_p9 = pnand %p1264_p7, %p392_p8 }
  0x2a   : > { %s399_s15 = sand.u32 (!%p393_p9), 1, %s1571_s27   ;;  %s1266_s16 = sshll.u32 (!%p393_p9), %s1583_s30, 4 }
  0x2b   : > { %396 = sbr.rel (%p393_p9) target bundleno = 736 (0x2e0), region = 89  ;;  %s1265_s17 = sshll.u32 (!%p393_p9), %s399_s15, 6 }
  0x2c   : > { %p439_p10 = scmp.lt.s32.totalorder (!%p393_p9), %s1266_s16, 47  ;;  %s1736_s26 = scalar_lea.vmem (!%p393_p9), [#allocation3], %s1265_s17 }
  0x2d   : > { %p1270_p11 = scmp.ne.s32.totalorder (!%p393_p9), %s1579_s29, 0 }
  0x30   : > { %s1930_s16 = smov (!%p439_p10, %s1266_s16), 47  ;;  %453 = sbr.rel (%p1270_p11) target bundleno = 70 (0x46), region = 97 }
  0x31   : > { %s1267_s19 = sshll.u32 %s1930_s16, 3 }
  0x32   : > { %s1729_s22 = scalar_lea.vmem %s1910_s2, %s1267_s19  ;;  %s1734_s25 = scalar_lea.vmem %s1916_s8, %s1267_s19 }
  0x35   : > { %v1597_v16 = vmov 0.0  }
  0x36   : > { %454 = vst [vmem:[#allocation2 + $0x30] sm:$0xff] %v1597_v16 }
  0x37   : > { %455 = vst [vmem:[#allocation2] sm:$0xff] %v1597_v16 }
  0x38   : > { %456 = vst [vmem:[#allocation2 + $0x58] sm:$0xff] %v1597_v16 }
  0x39   : > { %457 = vst [vmem:[#allocation2 + $0x18] sm:$0xff] %v1597_v16 }
  0x3a   : > { %458 = vst [vmem:[#allocation2 + $0x50] sm:$0xff] %v1597_v16 }
  0x3b   : > { %459 = vst [vmem:[#allocation2 + $0x68] sm:$0xff] %v1597_v16 }
  0x3c   : > { %460 = vst [vmem:[#allocation2 + $0x8] sm:$0xff] %v1597_v16 }
  0x3d   : > { %461 = vst [vmem:[#allocation2 + $0x48] sm:$0xff] %v1597_v16 }
  0x3e   : > { %462 = vst [vmem:[#allocation2 + $0x40] sm:$0xff] %v1597_v16 }
  0x3f   : > { %463 = vst [vmem:[#allocation2 + $0x20] sm:$0xff] %v1597_v16 }
  0x40   : > { %464 = vst [vmem:[#allocation2 + $0x10] sm:$0xff] %v1597_v16 }
  0x41   : > { %465 = vst [vmem:[#allocation2 + $0x38] sm:$0xff] %v1597_v16 }
  0x42   : > { %466 = vst [vmem:[#allocation2 + $0x60] sm:$0xff] %v1597_v16 }
  0x43   : > { %467 = vst [vmem:[#allocation2 + $0x70] sm:$0xff] %v1597_v16 }
  0x44   : > { %468 = vst [vmem:[#allocation2 + $0x78] sm:$0xff] %v1597_v16 }
  0x45   : > { %469 = vst [vmem:[#allocation2 + $0x28] sm:$0xff] %v1597_v16 }
  0x46 PF: > { %s1271_s27 = sshll.u32 %s1579_s29, 7  ;;  %v1404_v25 = vld [vmem:[%s1736_s26] sm:$0xff]  ;;  %v1406_v26 = vld [vmem:[%s1736_s26 + $0x10] sm:$0xff]  ;;  %v1405_v29 = vld [vmem:[%s1736_s26 + $0x8] sm:$0xff]  ;;  %p1337_p12 = scmp.ne.s32.totalorder %s1579_s29, 2 }
  0x47   : > { %s503_s30 = sshra.s32 %s1271_s27, 3  ;;  %v1408_v27 = vld [vmem:[%s1736_s26 + $0x20] sm:$0xff]  ;;  %v1410_v28 = vld [vmem:[%s1736_s26 + $0x30] sm:$0xff]  ;;  %v1407_v30 = vld [vmem:[%s1736_s26 + $0x18] sm:$0xff] }
  0x48   : > { %s1272_s14 = sshll.u32 %s503_s30, 2  ;;  %v1409_v31 = vld [vmem:[%s1736_s26 + $0x28] sm:$0xff]  ;;  %v1411_v32 = vld [vmem:[%s1736_s26 + $0x38] sm:$0xff]  ;;  %v471_v33 = vld [vmem:[#allocation2 + $0x30] sm:$0xff] }
  0x49   : > { %s1743_s17 = scalar_lea.vmem %s1909_s1, %s1272_s14  ;;  %v475_v34 = vld [vmem:[#allocation2 + $0x50] sm:$0xff]  ;;  %v479_v39 = vld [vmem:[#allocation2 + $0x40] sm:$0xff]  ;;  %v476_v42 = vld [vmem:[#allocation2 + $0x68] sm:$0xff] }
  0x4a   : > { %v1419_v17 = vld [vmem:[%s1743_s17 + $0x38] sm:$0xff]  ;;  %v1418_v18 = vld [vmem:[%s1743_s17 + $0x30] sm:$0xff]  ;;  %v1417_v19 = vld [vmem:[%s1743_s17 + $0x28] sm:$0xff] }
  0x4b   : > { %619 = vmatpush.bf16.msra.mxu0 %v1419_v17  ;;  %1436 = vmatpush.bf16.msra.mxu1 %v1419_v17  ;;  %v1416_v20 = vld [vmem:[%s1743_s17 + $0x20] sm:$0xff]  ;;  %v1415_v21 = vld [vmem:[%s1743_s17 + $0x18] sm:$0xff]  ;;  %v1414_v22 = vld [vmem:[%s1743_s17 + $0x10] sm:$0xff] }
  0x4c   : > { %1437 = vmatpush.bf16.msra.mxu2 %v1419_v17  ;;  %1438 = vmatpush.bf16.msra.mxu3 %v1419_v17  ;;  %v1413_v23 = vld [vmem:[%s1743_s17 + $0x8] sm:$0xff]  ;;  %v1412_v24 = vld [vmem:[%s1743_s17] sm:$0xff]  ;;  %v484_v52 = vld [vmem:[#allocation2 + $0x70] sm:$0xff] }
  0x4d   : > { %v483_v40 = vld [vmem:[#allocation2 + $0x60] sm:$0xff]  ;;  %v473_v53 = vld [vmem:[#allocation2 + $0x58] sm:$0xff]  ;;  %v477_v54 = vld [vmem:[#allocation2 + $0x8] sm:$0xff] }
  0x4e   : > { %v472_v41 = vld [vmem:[#allocation2] sm:$0xff]  ;;  %v481_v63 = vld [vmem:[#allocation2 + $0x10] sm:$0xff]  ;;  %v485_v0 = vld [vmem:[#allocation2 + $0x78] sm:$0xff] }
  0x4f   : > { %620 = vmatpush.bf16.msra.mxu0 %v1418_v18  ;;  %1439 = vmatpush.bf16.msra.mxu1 %v1418_v18  ;;  %v480_v51 = vld [vmem:[#allocation2 + $0x20] sm:$0xff]  ;;  %v474_v1 = vld [vmem:[#allocation2 + $0x18] sm:$0xff]  ;;  %v478_v2 = vld [vmem:[#allocation2 + $0x48] sm:$0xff] }
  0x50   : > { %1440 = vmatpush.bf16.msra.mxu2 %v1418_v18  ;;  %1441 = vmatpush.bf16.msra.mxu3 %v1418_v18  ;;  %v482_v11 = vld [vmem:[#allocation2 + $0x38] sm:$0xff]  ;;  %v486_v12 = vld [vmem:[#allocation2 + $0x28] sm:$0xff] }
  0x53   : > { %621 = vmatpush.bf16.msra.mxu0 %v1417_v19  ;;  %1442 = vmatpush.bf16.msra.mxu1 %v1417_v19 }
  0x54   : > { %1443 = vmatpush.bf16.msra.mxu2 %v1417_v19  ;;  %1444 = vmatpush.bf16.msra.mxu3 %v1417_v19 }
  0x57   : > { %622 = vmatpush.bf16.msra.mxu0 %v1416_v20  ;;  %1445 = vmatpush.bf16.msra.mxu1 %v1416_v20 }
  0x58   : > { %1446 = vmatpush.bf16.msra.mxu2 %v1416_v20  ;;  %1447 = vmatpush.bf16.msra.mxu3 %v1416_v20 }
  0x5b   : > { %623 = vmatpush.bf16.msra.mxu0 %v1415_v21  ;;  %1448 = vmatpush.bf16.msra.mxu1 %v1415_v21 }
  0x5c   : > { %1449 = vmatpush.bf16.msra.mxu2 %v1415_v21  ;;  %1450 = vmatpush.bf16.msra.mxu3 %v1415_v21 }
  0x5f   : > { %624 = vmatpush.bf16.msra.mxu0 %v1414_v22  ;;  %1451 = vmatpush.bf16.msra.mxu1 %v1414_v22 }
  0x60   : > { %1452 = vmatpush.bf16.msra.mxu2 %v1414_v22  ;;  %1453 = vmatpush.bf16.msra.mxu3 %v1414_v22 }
  0x63   : > { %625 = vmatpush.bf16.msra.mxu0 %v1413_v23  ;;  %1454 = vmatpush.bf16.msra.mxu1 %v1413_v23 }
  0x64   : > { %1455 = vmatpush.bf16.msra.mxu2 %v1413_v23  ;;  %1456 = vmatpush.bf16.msra.mxu3 %v1413_v23 }
  0x67   : > { %626 = vmatpush.bf16.msra.mxu0 %v1412_v24  ;;  %1457 = vmatpush.bf16.msra.mxu1 %v1412_v24 }
  0x68   : > { %1458 = vmatpush.bf16.msra.mxu2 %v1412_v24  ;;  %1459 = vmatpush.bf16.msra.mxu3 %v1412_v24 }
  0x6a   : > { %627 = vmatmul.bf16.vlgmr.msra.gmra.mxu0 %v1404_v25  ;;  %637 = vmatmul.bf16.vlgmr.msra.gmra.mxu1 %v1406_v26 }
  0x6b   : > { %647 = vmatmul.bf16.vlgmr.msra.gmra.mxu2 %v1408_v27  ;;  %657 = vmatmul.bf16.vlgmr.msra.gmra.mxu3 %v1410_v28 }
  0x7a   : > { %632 = vmatmul.bf16.gmra.mxu0 %v1405_v29  ;;  %642 = vmatmul.bf16.gmra.mxu1 %v1407_v30 }
  0x7b   : > { %652 = vmatmul.bf16.gmra.mxu2 %v1409_v31  ;;  %662 = vmatmul.bf16.gmra.mxu3 %v1411_v32 }
  0xe7   : > { %v628_v35 = vpop.f32.mrf.mxu0  ;;  %v638_v36 = vpop.f32.mrf.mxu1 }
  0xe8   : > { %v668_v37 = vadd.f32 %v628_v35, %v471_v33  ;;  %v672_v38 = vadd.f32 %v638_v36, %v475_v34 }
  0xea   : > { %684 = vst [vmem:[#allocation2 + $0x30] sm:$0xff] %v668_v37 }
  0xeb   : > { %688 = vst [vmem:[#allocation2 + $0x50] sm:$0xff] %v672_v38 }
  0xee   : > { %v648_v43 = vpop.f32.mrf.mxu2  ;;  %v658_v44 = vpop.f32.mrf.mxu3 }
  0xef   : > { %v676_v45 = vadd.f32 %v648_v43, %v479_v39  ;;  %v680_v46 = vadd.f32 %v658_v44, %v483_v40  ;;  %v630_v47 = vpop.f32.mrf.mxu0  ;;  %v640_v48 = vpop.f32.mrf.mxu1 }
  0xf0   : > { %v669_v49 = vadd.f32 %v630_v47, %v472_v41  ;;  %v673_v50 = vadd.f32 %v640_v48, %v476_v42 }
  0xf1   : > { %692 = vst [vmem:[#allocation2 + $0x40] sm:$0xff] %v676_v45 }
  0xf2   : > { %696 = vst [vmem:[#allocation2 + $0x60] sm:$0xff] %v680_v46 }
  0xf3   : > { %685 = vst [vmem:[#allocation2] sm:$0xff] %v669_v49 }
  0xf4   : > { %689 = vst [vmem:[#allocation2 + $0x68] sm:$0xff] %v673_v50 }
  0xf6   : > { %v650_v55 = vpop.f32.mrf.mxu2  ;;  %v660_v56 = vpop.f32.mrf.mxu3 }
  0xf7   : > { %v677_v57 = vadd.f32 %v650_v55, %v480_v51  ;;  %v681_v58 = vadd.f32 %v660_v56, %v484_v52  ;;  %v633_v59 = vpop.f32.mrf.mxu0  ;;  %v643_v60 = vpop.f32.mrf.mxu1 }
  0xf8   : > { %v670_v61 = vadd.f32 %v633_v59, %v473_v53  ;;  %v674_v62 = vadd.f32 %v643_v60, %v477_v54 }
  0xf9   : > { %693 = vst [vmem:[#allocation2 + $0x20] sm:$0xff] %v677_v57 }
  0xfa   : > { %697 = vst [vmem:[#allocation2 + $0x70] sm:$0xff] %v681_v58 }
  0xfb   : > { %686 = vst [vmem:[#allocation2 + $0x58] sm:$0xff] %v670_v61 }
  0xfc   : > { %690 = vst [vmem:[#allocation2 + $0x8] sm:$0xff] %v674_v62 }
  0xfe   : > { %v653_v3 = vpop.f32.mrf.mxu2  ;;  %v663_v4 = vpop.f32.mrf.mxu3 }
  0xff   : > { %v678_v5 = vadd.f32 %v653_v3, %v481_v63  ;;  %v682_v6 = vadd.f32 %v663_v4, %v485_v0  ;;  %v635_v7 = vpop.f32.mrf.mxu0  ;;  %v645_v8 = vpop.f32.mrf.mxu1 }
 0x100   : > { %v671_v9 = vadd.f32 %v635_v7, %v474_v1  ;;  %v675_v10 = vadd.f32 %v645_v8, %v478_v2 }
 0x101   : > { %694 = vst [vmem:[#allocation2 + $0x10] sm:$0xff] %v678_v5 }
 0x102   : > { %698 = vst [vmem:[#allocation2 + $0x78] sm:$0xff] %v682_v6 }
 0x103   : > { %687 = vst [vmem:[#allocation2 + $0x18] sm:$0xff] %v671_v9 }
 0x104   : > { %691 = vst [vmem:[#allocation2 + $0x48] sm:$0xff] %v675_v10 }
 0x106   : > { %v655_v13 = vpop.f32.mrf.mxu2  ;;  %v665_v14 = vpop.f32.mrf.mxu3  ;;  %703 = sbr.rel (%p1337_p12) target bundleno = 736 (0x2e0), region = 101 }
 0x107   : > { %v679_v15 = vadd.f32 %v655_v13, %v482_v11  ;;  %v683_v16 = vadd.f32 %v665_v14, %v486_v12 }
 0x109   : > { %695 = vst [vmem:[#allocation2 + $0x38] sm:$0xff] %v679_v15 }
 0x10a   : > { %699 = vst [vmem:[#allocation2 + $0x28] sm:$0xff] %v683_v16 }
 0x10b   : > { %v712_v17 = vld [vmem:[%s1729_s22 + $0x40] sm:$0xff]  ;;  %v1598_v19 = vmov 0   ;;  %v714_v20 = vld [vmem:[%s1729_s22 + $0x50] sm:$0xff]  ;;  %v713_v21 = vld [vmem:[%s1729_s22 + $0x48] sm:$0xff] }
 0x10c   : > { %v704_v18 = vld [vmem:[%s1729_s22] sm:$0xff]  ;;  %1536 = vset.pattern.permute.xlu1 %v1598_v19  ;;  %1535 = vset.pattern.permute.xlu0 %v1598_v19  ;;  %v705_v22 = vld [vmem:[%s1729_s22 + $0x8] sm:$0xff]  ;;  %v715_v23 = vld [vmem:[%s1729_s22 + $0x58] sm:$0xff] }
 0x10d   : > { %778 = vperm.xlu0 %1535, %v712_v17   ;;  %738 = vperm.xlu1 %1536, %v704_v18   ;;  %v1427_v24 = vld [vmem:[%s1912_s4 + $0x38] sm:$0xff]  ;;  %v706_v25 = vld [vmem:[%s1729_s22 + $0x10] sm:$0xff]  ;;  %v716_v27 = vld [vmem:[%s1729_s22 + $0x60] sm:$0xff] }
 0x10e   : > { %1537 = vset.pattern.permute.xlu2 %v1598_v19  ;;  %928 = vmatpush.bf16.msra.mxu0 %v1427_v24  ;;  %v707_v26 = vld [vmem:[%s1729_s22 + $0x18] sm:$0xff]  ;;  %v717_v28 = vld [vmem:[%s1729_s22 + $0x68] sm:$0xff]  ;;  %v708_v29 = vld [vmem:[%s1729_s22 + $0x20] sm:$0xff] }
 0x10f   : > { %788 = vperm.xlu2 %1537, %v714_v20   ;;  %1460 = vmatpush.bf16.msra.mxu2 %v1427_v24  ;;  %v709_v30 = vld [vmem:[%s1729_s22 + $0x28] sm:$0xff]  ;;  %v718_v31 = vld [vmem:[%s1729_s22 + $0x70] sm:$0xff]  ;;  %v719_v32 = vld [vmem:[%s1729_s22 + $0x78] sm:$0xff] }
 0x110   : > { %v710_v33 = vld [vmem:[%s1729_s22 + $0x30] sm:$0xff]  ;;  %v711_v34 = vld [vmem:[%s1729_s22 + $0x38] sm:$0xff]  ;;  %v1425_v36 = vld [vmem:[%s1912_s4 + $0x28] sm:$0xff] }
 0x111   : > { %v1426_v35 = vld [vmem:[%s1912_s4 + $0x30] sm:$0xff]  ;;  %v1424_v37 = vld [vmem:[%s1912_s4 + $0x20] sm:$0xff]  ;;  %v1423_v38 = vld [vmem:[%s1912_s4 + $0x18] sm:$0xff] }
 0x112   : > { %929 = vmatpush.bf16.msra.mxu0 %v1426_v35  ;;  %v1422_v39 = vld [vmem:[%s1912_s4 + $0x10] sm:$0xff]  ;;  %v1421_v40 = vld [vmem:[%s1912_s4 + $0x8] sm:$0xff]  ;;  %v1420_v41 = vld [vmem:[%s1912_s4] sm:$0xff] }
 0x113   : > { %1461 = vmatpush.bf16.msra.mxu2 %v1426_v35  ;;  %v720_v44 = vld [vmem:[#allocation2 + $0x30] sm:$0xff]  ;;  %v728_v45 = vld [vmem:[#allocation2 + $0x40] sm:$0xff]  ;;  %v731_v0 = vld [vmem:[#allocation2 + $0x38] sm:$0xff] }
 0x114   : > { %v729_v47 = vld [vmem:[#allocation2 + $0x20] sm:$0xff]  ;;  %v730_v62 = vld [vmem:[#allocation2 + $0x10] sm:$0xff]  ;;  %v722_v1 = vld [vmem:[#allocation2 + $0x58] sm:$0xff] }
 0x115   : > { %783 = vperm.xlu0 %1535, %v713_v21   ;;  %743 = vperm.xlu1 %1536, %v705_v22   ;;  %v721_v48 = vld [vmem:[#allocation2] sm:$0xff]  ;;  %v723_v3 = vld [vmem:[#allocation2 + $0x18] sm:$0xff]  ;;  %v1434_v18 = vld [vmem:[%s1914_s6 + $0x30] sm:$0xff] }
 0x116   : > { %930 = vmatpush.bf16.msra.mxu0 %v1425_v36  ;;  %v1805_v49 = vld [vmem:[%s1911_s3] ss:$0 sm:$0xff]  ;;  %v1435_v17 = vld [vmem:[%s1914_s6 + $0x38] sm:$0xff]  ;;  %v733_v19 = vld [vmem:[#allocation2 + $0x70] sm:$0xff] }
 0x117   : > { %793 = vperm.xlu2 %1537, %v715_v23   ;;  %1462 = vmatpush.bf16.msra.mxu2 %v1425_v36  ;;  %v724_v20 = vld [vmem:[#allocation2 + $0x50] sm:$0xff]  ;;  %v732_v22 = vld [vmem:[#allocation2 + $0x60] sm:$0xff]  ;;  %v725_v23 = vld [vmem:[#allocation2 + $0x68] sm:$0xff] }
 0x118   : > { %1101 = vmatpush.bf16.msra.mxu1 %v1435_v17  ;;  %1468 = vmatpush.bf16.msra.mxu3 %v1435_v17 }
 0x11a   : > { %931 = vmatpush.bf16.msra.mxu0 %v1424_v37 }
 0x11b   : > { %1463 = vmatpush.bf16.msra.mxu2 %v1424_v37 }
 0x11c   : > { %1102 = vmatpush.bf16.msra.mxu1 %v1434_v18  ;;  %1469 = vmatpush.bf16.msra.mxu3 %v1434_v18 }
 0x11d   : > { %748 = vperm.xlu0 %1535, %v706_v25   ;;  %753 = vperm.xlu1 %1536, %v707_v26   ;;  %v1433_v26 = vld [vmem:[%s1914_s6 + $0x28] sm:$0xff] }
 0x11e   : > { %932 = vmatpush.bf16.msra.mxu0 %v1423_v38 }
 0x11f   : > { %798 = vperm.xlu2 %1537, %v716_v27   ;;  %1464 = vmatpush.bf16.msra.mxu2 %v1423_v38  ;;  %v734_v38 = vld [vmem:[#allocation2 + $0x78] sm:$0xff] }
 0x120   : > { %1103 = vmatpush.bf16.msra.mxu1 %v1433_v26  ;;  %1470 = vmatpush.bf16.msra.mxu3 %v1433_v26 }
 0x122   : > { %933 = vmatpush.bf16.msra.mxu0 %v1422_v39 }
 0x123   : > { %1465 = vmatpush.bf16.msra.mxu2 %v1422_v39  ;;  %v735_v39 = vld [vmem:[#allocation2 + $0x28] sm:$0xff] }
 0x125   : > { %803 = vperm.xlu0 %1535, %v717_v28   ;;  %758 = vperm.xlu1 %1536, %v708_v29  }
 0x126   : > { %934 = vmatpush.bf16.msra.mxu0 %v1421_v40 }
 0x127   : > { %763 = vperm.xlu2 %1537, %v709_v30   ;;  %1466 = vmatpush.bf16.msra.mxu2 %v1421_v40 }
 0x12a   : > { %935 = vmatpush.bf16.msra.mxu0 %v1420_v41 }
 0x12b   : > { %1467 = vmatpush.bf16.msra.mxu2 %v1420_v41  ;;  %v727_v41 = vld [vmem:[#allocation2 + $0x48] sm:$0xff] }
 0x12d   : > { %808 = vperm.xlu0 %1535, %v718_v31   ;;  %813 = vperm.xlu1 %1536, %v719_v32  }
 0x12f   : > { %768 = vperm.xlu2 %1537, %v710_v33   ;;  %v1432_v33 = vld [vmem:[%s1914_s6 + $0x20] sm:$0xff] }
 0x130   : > { %1104 = vmatpush.bf16.msra.mxu1 %v1432_v33  ;;  %1471 = vmatpush.bf16.msra.mxu3 %v1432_v33 }
 0x135   : > { %773 = vperm.xlu0 %1535, %v711_v34  }
 0x169   : > { %v789_v50 = vpop.permute.xlu2 %788 }
 0x16a   : > { %v826_v5 = vmul.f32 %v789_v50, %v730_v62 }
 0x16c   : > { %v846_v9 = vadd.f32 %v1805_v49, %v826_v5 }
 0x171   : > { %v794_v63 = vpop.permute.xlu2 %793 }
 0x172   : > { %v827_v6 = vmul.f32 %v794_v63, %v731_v0 }
 0x174   : > { %v847_v10 = vadd.f32 %v1805_v49, %v827_v6 }
 0x176   : > { %v857_v15 = vpack.c.bf16 %v847_v10, %v846_v9 }
 0x179   : > { %v799_v13 = vpop.permute.xlu2 %798 }
 0x17a   : > { %v828_v28 = vmul.f32 %v799_v13, %v732_v22 }
 0x17c   : > { %v848_v34 = vadd.f32 %v1805_v49, %v828_v28 }
 0x17f   : > { %v779_v42 = vpop.permute.xlu0 %778  ;;  %v739_v43 = vpop.permute.xlu1 %738 }
 0x180   : > { %v816_v46 = vmul.f32 %v739_v43, %v720_v44  ;;  %v824_v51 = vmul.f32 %v779_v42, %v728_v45  ;;  %v726_v43 = vld [vmem:[#allocation2 + $0x8] sm:$0xff] }
 0x181   : > { %v764_v27 = vpop.permute.xlu2 %763 }
 0x182   : > { %v836_v54 = vadd.f32 %v1805_v49, %v816_v46  ;;  %v844_v57 = vadd.f32 %v1805_v49, %v824_v51  ;;  %v821_v29 = vmul.f32 %v764_v27, %v725_v23 }
 0x184   : > { %v841_v35 = vadd.f32 %v1805_v49, %v821_v29 }
 0x187   : > { %v784_v52 = vpop.permute.xlu0 %783  ;;  %v744_v53 = vpop.permute.xlu1 %743 }
 0x188   : > { %v825_v55 = vmul.f32 %v784_v52, %v729_v47  ;;  %v817_v56 = vmul.f32 %v744_v53, %v721_v48 }
 0x189   : > { %v769_v44 = vpop.permute.xlu2 %768 }
 0x18a   : > { %v845_v58 = vadd.f32 %v1805_v49, %v825_v55  ;;  %v837_v59 = vadd.f32 %v1805_v49, %v817_v56  ;;  %v822_v48 = vmul.f32 %v769_v44, %v726_v43  ;;  %v1431_v56 = vld [vmem:[%s1914_s6 + $0x18] sm:$0xff] }
 0x18b   : > { %1105 = vmatpush.bf16.msra.mxu1 %v1431_v56  ;;  %1472 = vmatpush.bf16.msra.mxu3 %v1431_v56 }
 0x18c   : > { %v852_v60 = vpack.c.bf16 %v837_v59, %v836_v54  ;;  %v856_v61 = vpack.c.bf16 %v845_v58, %v844_v57  ;;  %v842_v53 = vadd.f32 %v1805_v49, %v822_v48  ;;  %v1430_v57 = vld [vmem:[%s1914_s6 + $0x10] sm:$0xff]  ;;  %v1428_v58 = vld [vmem:[%s1914_s6] sm:$0xff] }
 0x18e   : > { %936 = vmatmul.bf16.vlgmr.msra.gmra.mxu0 %v852_v60  ;;  %956 = vmatmul.bf16.vlgmr.msra.gmra.mxu2 %v856_v61  ;;  %v1850_v60 = vld [vmem:[%s1913_s5] ss:$0 sm:$0xff] }
 0x18f   : > { %v749_v2 = vpop.permute.xlu0 %748  ;;  %v754_v4 = vpop.permute.xlu1 %753  ;;  %1106 = vmatpush.bf16.msra.mxu1 %v1430_v57  ;;  %1473 = vmatpush.bf16.msra.mxu3 %v1430_v57 }
 0x190   : > { %v818_v7 = vmul.f32 %v749_v2, %v722_v1  ;;  %v819_v8 = vmul.f32 %v754_v4, %v723_v3 }
 0x192   : > { %v838_v11 = vadd.f32 %v1805_v49, %v818_v7  ;;  %v839_v12 = vadd.f32 %v1805_v49, %v819_v8 }
 0x194   : > { %v853_v14 = vpack.c.bf16 %v839_v12, %v838_v11 }
 0x197   : > { %v804_v16 = vpop.permute.xlu0 %803  ;;  %v759_v21 = vpop.permute.xlu1 %758 }
 0x198   : > { %v829_v24 = vmul.f32 %v804_v16, %v733_v19  ;;  %v820_v25 = vmul.f32 %v759_v21, %v724_v20 }
 0x19a   : > { %v849_v31 = vadd.f32 %v1805_v49, %v829_v24  ;;  %v840_v32 = vadd.f32 %v1805_v49, %v820_v25 }
 0x19c   : > { %v854_v36 = vpack.c.bf16 %v841_v35, %v840_v32  ;;  %v858_v37 = vpack.c.bf16 %v849_v31, %v848_v34 }
 0x19e   : > { %941 = vmatmul.bf16.gmra.mxu0 %v853_v14  ;;  %961 = vmatmul.bf16.gmra.mxu2 %v857_v15 }
 0x19f   : > { %v809_v30 = vpop.permute.xlu0 %808  ;;  %v814_v40 = vpop.permute.xlu1 %813 }
 0x1a0   : > { %v830_v45 = vmul.f32 %v809_v30, %v734_v38  ;;  %v831_v46 = vmul.f32 %v814_v40, %v735_v39 }
 0x1a2   : > { %v850_v50 = vadd.f32 %v1805_v49, %v830_v45  ;;  %v851_v51 = vadd.f32 %v1805_v49, %v831_v46 }
 0x1a4   : > { %v859_v55 = vpack.c.bf16 %v851_v51, %v850_v50 }
 0x1a7   : > { %v774_v42 = vpop.permute.xlu0 %773 }
 0x1a8   : > { %v823_v47 = vmul.f32 %v774_v42, %v727_v41 }
 0x1aa   : > { %v843_v52 = vadd.f32 %v1805_v49, %v823_v47  ;;  %v1429_v49 = vld [vmem:[%s1914_s6 + $0x8] sm:$0xff] }
 0x1ab   : > { %1107 = vmatpush.bf16.msra.mxu1 %v1429_v49  ;;  %1474 = vmatpush.bf16.msra.mxu3 %v1429_v49 }
 0x1ac   : > { %v855_v54 = vpack.c.bf16 %v843_v52, %v842_v53 }
 0x1ae   : > { %946 = vmatmul.bf16.gmra.mxu0 %v854_v36  ;;  %966 = vmatmul.bf16.gmra.mxu2 %v858_v37 }
 0x1af   : > { %1108 = vmatpush.bf16.msra.mxu1 %v1428_v58  ;;  %1475 = vmatpush.bf16.msra.mxu3 %v1428_v58 }
 0x1be   : > { %951 = vmatmul.bf16.gmra.mxu0 %v855_v54  ;;  %971 = vmatmul.bf16.gmra.mxu2 %v859_v55 }
 0x20b   : > { %v937_v59 = vpop.f32.mrf.mxu0 }
 0x20c   : > { %v938_v61 = vadd.f32 %v1850_v60, %v937_v59 }
 0x20e   : > { %v993_v0 = vmul.f32 0.01, %v938_v61  ;;  %vm977_vm0 = vcmp.gt.f32.partialorder %v938_v61, 0.0 }
 0x210   : > { %v1009_v4 = vsel %vm977_vm0, %v938_v61, %v993_v0 }
 0x211   : > { %v957_v62 = vpop.f32.mrf.mxu2 }
 0x212   : > { %v958_v2 = vadd.f32 %v1850_v60, %v957_v62 }
 0x213   : > { %v939_v63 = vpop.f32.mrf.mxu0 }
 0x214   : > { %v940_v1 = vadd.f32 %v1850_v60, %v939_v63  ;;  %v1001_v8 = vmul.f32 0.01, %v958_v2  ;;  %vm985_vm2 = vcmp.gt.f32.partialorder %v958_v2, 0.0 }
 0x216   : > { %v994_v3 = vmul.f32 0.01, %v940_v1  ;;  %vm978_vm1 = vcmp.gt.f32.partialorder %v940_v1, 0.0  ;;  %v1017_v12 = vsel %vm985_vm2, %v958_v2, %v1001_v8 }
 0x218   : > { %v1010_v5 = vsel %vm978_vm1, %v940_v1, %v994_v3 }
 0x219   : > { %v959_v6 = vpop.f32.mrf.mxu2  ;;  %v1025_v7 = vpack.c.bf16 %v1010_v5, %v1009_v4  ;;  %v1540_v5 = vld [vmem:[%s1915_s7] ss:$0 sm:$0xff] }
 0x21a   : > { %v960_v9 = vadd.f32 %v1850_v60, %v959_v6 }
 0x21b   : > { %v942_v10 = vpop.f32.mrf.mxu0  ;;  %1109 = vmatmul.bf16.vlgmr.msra.gmra.mxu1 %v1025_v7 }
 0x21c   : > { %v1002_v11 = vmul.f32 0.01, %v960_v9  ;;  %vm986_vm3 = vcmp.gt.f32.partialorder %v960_v9, 0.0  ;;  %v943_v15 = vadd.f32 %v1850_v60, %v942_v10 }
 0x21e   : > { %v1018_v13 = vsel %vm986_vm3, %v960_v9, %v1002_v11  ;;  %v995_v18 = vmul.f32 0.01, %v943_v15  ;;  %vm979_vm4 = vcmp.gt.f32.partialorder %v943_v15, 0.0 }
 0x21f   : > { %v1029_v14 = vpack.c.bf16 %v1018_v13, %v1017_v12 }
 0x220   : > { %v1011_v22 = vsel %vm979_vm4, %v943_v15, %v995_v18 }
 0x221   : > { %v962_v16 = vpop.f32.mrf.mxu2  ;;  %1129 = vmatmul.bf16.vlgmr.msra.gmra.mxu3 %v1029_v14 }
 0x222   : > { %v963_v20 = vadd.f32 %v1850_v60, %v962_v16 }
 0x223   : > { %v944_v17 = vpop.f32.mrf.mxu0 }
 0x224   : > { %v945_v19 = vadd.f32 %v1850_v60, %v944_v17  ;;  %v1003_v26 = vmul.f32 0.01, %v963_v20  ;;  %vm987_vm6 = vcmp.gt.f32.partialorder %v963_v20, 0.0 }
 0x226   : > { %v996_v21 = vmul.f32 0.01, %v945_v19  ;;  %vm980_vm5 = vcmp.gt.f32.partialorder %v945_v19, 0.0  ;;  %v1019_v30 = vsel %vm987_vm6, %v963_v20, %v1003_v26 }
 0x228   : > { %v1012_v23 = vsel %vm980_vm5, %v945_v19, %v996_v21 }
 0x229   : > { %v964_v24 = vpop.f32.mrf.mxu2  ;;  %v1026_v25 = vpack.c.bf16 %v1012_v23, %v1011_v22 }
 0x22a   : > { %v965_v27 = vadd.f32 %v1850_v60, %v964_v24 }
 0x22b   : > { %v947_v28 = vpop.f32.mrf.mxu0  ;;  %1114 = vmatmul.bf16.gmra.mxu1 %v1026_v25 }
 0x22c   : > { %v1004_v29 = vmul.f32 0.01, %v965_v27  ;;  %vm988_vm7 = vcmp.gt.f32.partialorder %v965_v27, 0.0  ;;  %v948_v33 = vadd.f32 %v1850_v60, %v947_v28 }
 0x22e   : > { %v1020_v31 = vsel %vm988_vm7, %v965_v27, %v1004_v29  ;;  %v997_v36 = vmul.f32 0.01, %v948_v33  ;;  %vm981_vm8 = vcmp.gt.f32.partialorder %v948_v33, 0.0 }
 0x22f   : > { %v1030_v32 = vpack.c.bf16 %v1020_v31, %v1019_v30 }
 0x230   : > { %v1013_v40 = vsel %vm981_vm8, %v948_v33, %v997_v36 }
 0x231   : > { %v967_v34 = vpop.f32.mrf.mxu2  ;;  %1134 = vmatmul.bf16.gmra.mxu3 %v1030_v32 }
 0x232   : > { %v968_v38 = vadd.f32 %v1850_v60, %v967_v34 }
 0x233   : > { %v949_v35 = vpop.f32.mrf.mxu0 }
 0x234   : > { %v950_v37 = vadd.f32 %v1850_v60, %v949_v35  ;;  %v1005_v44 = vmul.f32 0.01, %v968_v38  ;;  %vm989_vm10 = vcmp.gt.f32.partialorder %v968_v38, 0.0 }
 0x236   : > { %v998_v39 = vmul.f32 0.01, %v950_v37  ;;  %vm982_vm9 = vcmp.gt.f32.partialorder %v950_v37, 0.0  ;;  %v1021_v48 = vsel %vm989_vm10, %v968_v38, %v1005_v44 }
 0x238   : > { %v1014_v41 = vsel %vm982_vm9, %v950_v37, %v998_v39 }
 0x239   : > { %v969_v42 = vpop.f32.mrf.mxu2  ;;  %v1027_v43 = vpack.c.bf16 %v1014_v41, %v1013_v40 }
 0x23a   : > { %v970_v45 = vadd.f32 %v1850_v60, %v969_v42 }
 0x23b   : > { %v952_v46 = vpop.f32.mrf.mxu0  ;;  %1119 = vmatmul.bf16.gmra.mxu1 %v1027_v43 }
 0x23c   : > { %v1006_v47 = vmul.f32 0.01, %v970_v45  ;;  %vm990_vm11 = vcmp.gt.f32.partialorder %v970_v45, 0.0  ;;  %v953_v52 = vadd.f32 %v1850_v60, %v952_v46 }
 0x23e   : > { %v1022_v50 = vsel %vm990_vm11, %v970_v45, %v1006_v47  ;;  %v999_v55 = vmul.f32 0.01, %v953_v52  ;;  %vm983_vm12 = vcmp.gt.f32.partialorder %v953_v52, 0.0 }
 0x23f   : > { %v1031_v51 = vpack.c.bf16 %v1022_v50, %v1021_v48 }
 0x240   : > { %v1015_v58 = vsel %vm983_vm12, %v953_v52, %v999_v55 }
 0x241   : > { %v972_v53 = vpop.f32.mrf.mxu2  ;;  %1139 = vmatmul.bf16.gmra.mxu3 %v1031_v51 }
 0x242   : > { %v973_v57 = vadd.f32 %v1850_v60, %v972_v53 }
 0x243   : > { %v954_v54 = vpop.f32.mrf.mxu0 }
 0x244   : > { %v955_v56 = vadd.f32 %v1850_v60, %v954_v54  ;;  %v1007_v63 = vmul.f32 0.01, %v973_v57  ;;  %vm991_vm14 = vcmp.gt.f32.partialorder %v973_v57, 0.0 }
 0x246   : > { %v1000_v49 = vmul.f32 0.01, %v955_v56  ;;  %vm984_vm13 = vcmp.gt.f32.partialorder %v955_v56, 0.0  ;;  %v1023_v2 = vsel %vm991_vm14, %v973_v57, %v1007_v63 }
 0x248   : > { %v1016_v59 = vsel %vm984_vm13, %v955_v56, %v1000_v49 }
 0x249   : > { %v974_v61 = vpop.f32.mrf.mxu2  ;;  %v1028_v62 = vpack.c.bf16 %v1016_v59, %v1015_v58 }
 0x24a   : > { %v975_v0 = vadd.f32 %v1850_v60, %v974_v61 }
 0x24b   : > { %1124 = vmatmul.bf16.gmra.mxu1 %v1028_v62 }
 0x24c   : > { %v1008_v1 = vmul.f32 0.01, %v975_v0  ;;  %vm992_vm15 = vcmp.gt.f32.partialorder %v975_v0, 0.0 }
 0x24e   : > { %v1024_v3 = vsel %vm992_vm15, %v975_v0, %v1008_v1 }
 0x24f   : > { %v1032_v4 = vpack.c.bf16 %v1024_v3, %v1023_v2 }
 0x251   : > { %1144 = vmatmul.bf16.gmra.mxu3 %v1032_v4 }
 0x298   : > { %v1110_v6 = vpop.f32.mrf.mxu1 }
 0x299   : > { %v1111_v7 = vadd.f32 %v1540_v5, %v1110_v6 }
 0x29b   : > { %1150 = vst [vmem:[%s1734_s25] sm:$0xff] %v1111_v7 }
 0x2a0   : > { %v1112_v60 = vpop.f32.mrf.mxu1 }
 0x2a1   : > { %v1113_v8 = vadd.f32 %v1540_v5, %v1112_v60 }
 0x2a3   : > { %1151 = vst [vmem:[%s1734_s25 + $0x8] sm:$0xff] %v1113_v8 }
 0x2a4   : > { %v1130_v9 = vpop.f32.mrf.mxu3 }
 0x2a5   : > { %v1131_v10 = vadd.f32 %v1540_v5, %v1130_v9 }
 0x2a7   : > { %1158 = vst [vmem:[%s1734_s25 + $0x40] sm:$0xff] %v1131_v10 }
 0x2a8   : > { %v1115_v11 = vpop.f32.mrf.mxu1 }
 0x2a9   : > { %v1116_v12 = vadd.f32 %v1540_v5, %v1115_v11 }
 0x2ab   : > { %1152 = vst [vmem:[%s1734_s25 + $0x10] sm:$0xff] %v1116_v12 }
 0x2ac   : > { %v1132_v13 = vpop.f32.mrf.mxu3 }
 0x2ad   : > { %v1133_v14 = vadd.f32 %v1540_v5, %v1132_v13 }
 0x2af   : > { %1159 = vst [vmem:[%s1734_s25 + $0x48] sm:$0xff] %v1133_v14 }
 0x2b0   : > { %v1117_v15 = vpop.f32.mrf.mxu1 }
 0x2b1   : > { %v1118_v16 = vadd.f32 %v1540_v5, %v1117_v15 }
 0x2b3   : > { %1153 = vst [vmem:[%s1734_s25 + $0x18] sm:$0xff] %v1118_v16 }
 0x2b4   : > { %v1135_v17 = vpop.f32.mrf.mxu3 }
 0x2b5   : > { %v1136_v18 = vadd.f32 %v1540_v5, %v1135_v17 }
 0x2b7   : > { %1160 = vst [vmem:[%s1734_s25 + $0x50] sm:$0xff] %v1136_v18 }
 0x2b8   : > { %v1120_v19 = vpop.f32.mrf.mxu1 }
 0x2b9   : > { %v1121_v20 = vadd.f32 %v1540_v5, %v1120_v19 }
 0x2bb   : > { %1154 = vst [vmem:[%s1734_s25 + $0x20] sm:$0xff] %v1121_v20 }
 0x2bc   : > { %v1137_v21 = vpop.f32.mrf.mxu3 }
 0x2bd   : > { %v1138_v22 = vadd.f32 %v1540_v5, %v1137_v21 }
 0x2bf   : > { %1161 = vst [vmem:[%s1734_s25 + $0x58] sm:$0xff] %v1138_v22 }
 0x2c0   : > { %v1122_v23 = vpop.f32.mrf.mxu1 }
 0x2c1   : > { %v1123_v24 = vadd.f32 %v1540_v5, %v1122_v23 }
 0x2c3   : > { %1155 = vst [vmem:[%s1734_s25 + $0x28] sm:$0xff] %v1123_v24 }
 0x2c4   : > { %v1140_v25 = vpop.f32.mrf.mxu3 }
 0x2c5   : > { %v1141_v26 = vadd.f32 %v1540_v5, %v1140_v25 }
 0x2c7   : > { %1162 = vst [vmem:[%s1734_s25 + $0x60] sm:$0xff] %v1141_v26 }
 0x2c8   : > { %v1125_v27 = vpop.f32.mrf.mxu1 }
 0x2c9   : > { %v1126_v28 = vadd.f32 %v1540_v5, %v1125_v27 }
 0x2cb   : > { %1156 = vst [vmem:[%s1734_s25 + $0x30] sm:$0xff] %v1126_v28 }
 0x2cc   : > { %v1142_v29 = vpop.f32.mrf.mxu3 }
 0x2cd   : > { %v1143_v30 = vadd.f32 %v1540_v5, %v1142_v29 }
 0x2cf   : > { %1163 = vst [vmem:[%s1734_s25 + $0x68] sm:$0xff] %v1143_v30 }
 0x2d0   : > { %v1127_v31 = vpop.f32.mrf.mxu1 }
 0x2d1   : > { %v1128_v32 = vadd.f32 %v1540_v5, %v1127_v31 }
 0x2d3   : > { %1157 = vst [vmem:[%s1734_s25 + $0x38] sm:$0xff] %v1128_v32 }
 0x2d4   : > { %v1145_v33 = vpop.f32.mrf.mxu3 }
 0x2d5   : > { %v1146_v34 = vadd.f32 %v1540_v5, %v1145_v33 }
 0x2d7   : > { %1164 = vst [vmem:[%s1734_s25 + $0x70] sm:$0xff] %v1146_v34 }
 0x2dc   : > { %v1147_v35 = vpop.f32.mrf.mxu3 }
 0x2dd   : > { %v1148_v36 = vadd.f32 %v1540_v5, %v1147_v35 }
 0x2df   : > { %1165 = vst [vmem:[%s1734_s25 + $0x78] sm:$0xff] %v1148_v36 }
 0x2e0 PF: > { %s18_s11 = sadd.s32 1, %s1595_s11   ;;  %s1917_s27 = smov %s1575_s28 }
 0x2e1   : > { %p15_p13 = scmp.ge.s32.totalorder %s18_s11, 11   ;;  %s1918_s28 = smov %s1695_s18 }
 0x2e2   : > { %s1919_s29 = smov %s1587_s9  ;;  %s1920_s30 = smov %s1591_s10 }
 0x2e3   : > { %s1921_s9 = smov %s1924_s12  ;;  %s1922_s10 = smov %s1928_s13 }
 0x2e4   :  { %17 = sbr.rel (!%p15_p13) target bundleno = 4 (0x4), region = 140 }

</bundles_post_ra>
